<compile_context>
chip_gen: v5e
topology: v5e:2x2
jax: 0.10.0
libtpu: 0.0.40
codegen_flags: <defaults>
</compile_context>

<pallas_src>
import math
import functools

import jax
import jax.numpy as jnp
from jax import lax
from jax.experimental import pallas as pl
from jax.experimental.pallas import tpu as pltpu


CFG = dict(
    vocab_size=100,
    max_position=32,
    type_vocab=2,
    hidden=32,
    num_heads=2,
    num_layers=2,
    intermediate=64,
    n_classes=3,
)

LANE = 128       # lane-dense pad width for the tiny classifier output
LN_EPS = 1e-12


def _full_spec(shape):
    nd = len(shape)
    return pl.BlockSpec(shape, lambda i, _nd=nd: (0,) * _nd)


def _ln(v, g, b):
    mu = jnp.mean(v, axis=-1, keepdims=True)
    var = jnp.mean((v - mu) * (v - mu), axis=-1, keepdims=True)
    return (v - mu) * lax.rsqrt(var + LN_EPS) * g + b


# -------------------- kernel 1: embedding LayerNorm --------------------

def _emb_ln_kernel(x_ref, g_ref, b_ref, o_ref):
    o_ref[...] = _ln(x_ref[...], g_ref[...], b_ref[...])


def pallas_embedding_layernorm(x, gamma, beta):
    M, H = x.shape
    return pl.pallas_call(
        _emb_ln_kernel,
        out_shape=jax.ShapeDtypeStruct((M, H), jnp.float32),
        grid=(1,),
        in_specs=[_full_spec((M, H)), _full_spec((1, H)), _full_spec((1, H))],
        out_specs=_full_spec((M, H)),
    )(x, gamma, beta)


# -------------------- kernel 2: fused transformer layer --------------------

def _layer_kernel(x_ref, maskb_ref, wqkv_ref, bqkv_ref, wo_ref, bo_ref,
                  ln1g_ref, ln1b_ref, w1_ref, b1_ref, w2_ref, b2_ref,
                  ln2g_ref, ln2b_ref, o_ref, ctx_ref, *, B, S, H, nh):
    Dh = H // nh
    scale = 1.0 / math.sqrt(Dh)

    x = x_ref[...]                                              # (B*S, H)
    maskb = maskb_ref[...]                                      # (B, S) additive bias

    # Fused QKV projection: one MXU matmul instead of three pallas_calls.
    qkv = jnp.dot(x, wqkv_ref[...], preferred_element_type=jnp.float32) + bqkv_ref[...]
    q = qkv[:, 0:H]
    k = qkv[:, H:2 * H]
    v = qkv[:, 2 * H:3 * H]

    # Multi-head attention: all (batch, head) pairs in this single kernel,
    # statically unrolled; head split via static column slices (no XLA transposes).
    for b in range(B):
        bias_b = maskb[b:b + 1, :]                              # (1, S)
        r0 = b * S
        for h in range(nh):
            c0 = h * Dh
            qbh = q[r0:r0 + S, c0:c0 + Dh]                      # (S, Dh)
            kbh = k[r0:r0 + S, c0:c0 + Dh]
            vbh = v[r0:r0 + S, c0:c0 + Dh]
            s = lax.dot_general(qbh, kbh, (((1,), (1,)), ((), ())),
                                preferred_element_type=jnp.float32) * scale
            s = s + bias_b                                      # (S, S)
            mx = jnp.max(s, axis=-1, keepdims=True)
            p = jnp.exp(s - mx)
            p = p * pl.reciprocal(jnp.sum(p, axis=-1, keepdims=True), approx=True)
            ctx_ref[r0:r0 + S, c0:c0 + Dh] = jnp.dot(
                p, vbh, preferred_element_type=jnp.float32)

    ctx = ctx_ref[...]                                          # (B*S, H)

    # Attention output projection + residual + LayerNorm (fused).
    attn_out = jnp.dot(ctx, wo_ref[...], preferred_element_type=jnp.float32) + bo_ref[...]
    h1 = _ln(x + attn_out, ln1g_ref[...], ln1b_ref[...])

    # Feed-forward (exact erf GELU, as in BERT) + residual + LayerNorm (fused).
    ff = jnp.dot(h1, w1_ref[...], preferred_element_type=jnp.float32) + b1_ref[...]
    ff = 0.5 * ff * (1.0 + lax.erf(ff * (1.0 / math.sqrt(2.0))))
    ff = jnp.dot(ff, w2_ref[...], preferred_element_type=jnp.float32) + b2_ref[...]
    o_ref[...] = _ln(h1 + ff, ln2g_ref[...], ln2b_ref[...])


def pallas_transformer_layer(x, mask_bias, layer, *, B, S, H, nh, I):
    kernel = functools.partial(_layer_kernel, B=B, S=S, H=H, nh=nh)
    return pl.pallas_call(
        kernel,
        out_shape=jax.ShapeDtypeStruct((B * S, H), jnp.float32),
        grid=(1,),
        in_specs=[
            _full_spec((B * S, H)),      # x
            _full_spec((B, S)),          # additive mask bias
            _full_spec((H, 3 * H)),      # wqkv (fused)
            _full_spec((1, 3 * H)),      # bqkv (fused)
            _full_spec((H, H)),          # wo
            _full_spec((1, H)),          # bo
            _full_spec((1, H)),          # ln1_g
            _full_spec((1, H)),          # ln1_b
            _full_spec((H, I)),          # w1
            _full_spec((1, I)),          # b1
            _full_spec((I, H)),          # w2
            _full_spec((1, H)),          # b2
            _full_spec((1, H)),          # ln2_g
            _full_spec((1, H)),          # ln2_b
        ],
        out_specs=_full_spec((B * S, H)),
        scratch_shapes=[pltpu.VMEM((B * S, H), jnp.float32)],   # attention context buffer
    )(x, mask_bias, layer["wqkv"], layer["bqkv"], layer["wo"], layer["bo"],
      layer["ln1_g"], layer["ln1_b"], layer["w1"], layer["b1"],
      layer["w2"], layer["b2"], layer["ln2_g"], layer["ln2_b"])


# -------------------- kernel 3: pooler + dropout(eval) + classifier --------------------

def _head_kernel(cls_ref, pw_ref, pb_ref, ow_ref, ob_ref, o_ref):
    pooled = jnp.tanh(jnp.dot(cls_ref[...], pw_ref[...],
                              preferred_element_type=jnp.float32) + pb_ref[...])
    # TODO(synk): nn.Dropout(p=0.3) is identity in eval mode; training-mode stochastic
    # dropout (pltpu.prng_*) is not replicated here.
    o_ref[...] = jnp.dot(pooled, ow_ref[...],
                         preferred_element_type=jnp.float32) + ob_ref[...]


def pallas_pooler_head(cls, pool_w, pool_b, out_w_pad, out_b_pad):
    B, H = cls.shape
    N = out_w_pad.shape[1]
    return pl.pallas_call(
        _head_kernel,
        out_shape=jax.ShapeDtypeStruct((B, N), jnp.float32),
        grid=(1,),
        in_specs=[_full_spec((B, H)), _full_spec((H, H)), _full_spec((1, H)),
                  _full_spec((H, N)), _full_spec((1, N))],
        out_specs=_full_spec((B, N)),
    )(cls, pool_w, pool_b, out_w_pad, out_b_pad)


# -------------------- parameters --------------------

def init_params(key, cfg):
    H, I, NC = cfg["hidden"], cfg["intermediate"], cfg["n_classes"]

    def nrm(k, shape):
        return 0.02 * jax.random.normal(k, shape, dtype=jnp.float32)

    keys = iter(jax.random.split(key, 64))
    out_w = nrm(next(keys), (H, NC))
    p = {
        "word_emb": nrm(next(keys), (cfg["vocab_size"], H)),
        "pos_emb": nrm(next(keys), (cfg["max_position"], H)),
        "type_emb": nrm(next(keys), (cfg["type_vocab"], H)),
        "emb_ln_g": jnp.ones((1, H), jnp.float32),
        "emb_ln_b": jnp.zeros((1, H), jnp.float32),
        "layers": [],
        "pool_w": nrm(next(keys), (H, H)),
        "pool_b": jnp.zeros((1, H), jnp.float32),
        # classifier padded to a lane-dense width; logits sliced back outside the kernel
        "out_w_pad": jnp.zeros((H, LANE), jnp.float32).at[:, :NC].set(out_w),
        "out_b_pad": jnp.zeros((1, LANE), jnp.float32),
    }
    for _ in range(cfg["num_layers"]):
        wq = nrm(next(keys), (H, H))
        wk = nrm(next(keys), (H, H))
        wv = nrm(next(keys), (H, H))
        p["layers"].append({
            "wqkv": jnp.concatenate([wq, wk, wv], axis=1),           # fused (H, 3H)
            "bqkv": jnp.zeros((1, 3 * H), jnp.float32),
            "wo": nrm(next(keys), (H, H)), "bo": jnp.zeros((1, H), jnp.float32),
            "ln1_g": jnp.ones((1, H), jnp.float32), "ln1_b": jnp.zeros((1, H), jnp.float32),
            "w1": nrm(next(keys), (H, I)), "b1": jnp.zeros((1, I), jnp.float32),
            "w2": nrm(next(keys), (I, H)), "b2": jnp.zeros((1, H), jnp.float32),
            "ln2_g": jnp.ones((1, H), jnp.float32), "ln2_b": jnp.zeros((1, H), jnp.float32),
        })
    return p


# -------------------- forward pass --------------------

def sentiment_classifier_forward(params, input_ids, attention_mask, cfg):
    B, S = input_ids.shape
    H, nh, I, NC = cfg["hidden"], cfg["num_heads"], cfg["intermediate"], cfg["n_classes"]

    # Embeddings (gather is XLA glue; LayerNorm runs in a Pallas kernel).
    emb = (params["word_emb"][input_ids]
           + params["pos_emb"][:S][None, :, :]
           + params["type_emb"][0][None, None, :])
    x = pallas_embedding_layernorm(emb.reshape(B * S, H),
                                   params["emb_ln_g"], params["emb_ln_b"])

    # Additive attention-mask bias precomputed once, shared across layers/heads.
    mask_bias = (1.0 - attention_mask.astype(jnp.float32)) * (-1e9)   # (B, S)

    # One fused pallas_call per transformer layer.
    for layer in params["layers"]:
        x = pallas_transformer_layer(x, mask_bias, layer, B=B, S=S, H=H, nh=nh, I=I)

    # Pooler on [CLS] + dropout(eval=identity) + classification head in one kernel.
    cls = x.reshape(B, S, H)[:, 0, :]
    logits_pad = pallas_pooler_head(cls, params["pool_w"], params["pool_b"],
                                    params["out_w_pad"], params["out_b_pad"])
    return logits_pad[:, :NC]


# -------------------- main --------------------

if __name__ == "__main__":
    cfg = CFG
    key = jax.random.PRNGKey(0)
    pkey, ikey = jax.random.split(key)

    params = init_params(pkey, cfg)

    B, S = 2, 8
    input_ids = jax.random.randint(ikey, (B, S), 0, cfg["vocab_size"], dtype=jnp.int32)
    attention_mask = jnp.array(
        [[1, 1, 1, 1, 1, 1, 1, 1],
         [1, 1, 1, 1, 1, 0, 0, 0]], dtype=jnp.int32)

    forward = jax.jit(lambda p, ids, m: sentiment_classifier_forward(p, ids, m, cfg))
    logits = forward(params, input_ids, attention_mask)
    logits = jax.block_until_ready(logits)

    assert logits.shape == (B, cfg["n_classes"])
    assert bool(jnp.all(jnp.isfinite(logits)))
    print("KERNEL_OK")
</pallas_src>

<mosaic_0001>
module attributes {stable_mosaic.version = 11 : i64} {
  func.func @_head_kernel(%arg0: i32, %arg1: memref<2x32xf32, #tpu.memory_space<vmem>>, %arg2: memref<32x32xf32, #tpu.memory_space<vmem>>, %arg3: memref<1x32xf32, #tpu.memory_space<vmem>>, %arg4: memref<32x128xf32, #tpu.memory_space<vmem>>, %arg5: memref<1x128xf32, #tpu.memory_space<vmem>>, %arg6: memref<2x128xf32, #tpu.memory_space<vmem>>) attributes {dimension_semantics = [#tpu.dimension_semantics<arbitrary>], iteration_bounds = array<i64: 1>, scalar_prefetch = 0 : i64, scratch_operands = 0 : i64, tpu.core_type = #tpu.core_type<tc>, window_params = [{pipeline_mode = #tpu.pipeline_mode<synchronous>, transform_indices = @transform_0, window_bounds = array<i64: 2, 32>}, {pipeline_mode = #tpu.pipeline_mode<synchronous>, transform_indices = @transform_1, window_bounds = array<i64: 32, 32>}, {pipeline_mode = #tpu.pipeline_mode<synchronous>, transform_indices = @transform_2, window_bounds = array<i64: 1, 32>}, {pipeline_mode = #tpu.pipeline_mode<synchronous>, transform_indices = @transform_3, window_bounds = array<i64: 32, 128>}, {pipeline_mode = #tpu.pipeline_mode<synchronous>, transform_indices = @transform_4, window_bounds = array<i64: 1, 128>}, {pipeline_mode = #tpu.pipeline_mode<synchronous>, transform_indices = @transform_5, window_bounds = array<i64: 2, 128>}]} {
    %c0 = arith.constant 0 : index
    %c0_0 = arith.constant 0 : index
    %0 = vector.load %arg1[%c0, %c0_0] : memref<2x32xf32, #tpu.memory_space<vmem>>, vector<2x32xf32>
    %c0_1 = arith.constant 0 : index
    %c0_2 = arith.constant 0 : index
    %1 = vector.load %arg2[%c0_1, %c0_2] : memref<32x32xf32, #tpu.memory_space<vmem>>, vector<32x32xf32>
    %cst = arith.constant dense<0.000000e+00> : vector<2x32xf32>
    %2 = tpu.matmul %0, %1, %cst {dimension_numbers = #tpu.dot_dimension_numbers<[1], [0], [0], [1], [0, 0, 1, 1], [], []>} : vector<2x32xf32>, vector<32x32xf32>, vector<2x32xf32> -> vector<2x32xf32>
    %c0_3 = arith.constant 0 : index
    %c0_4 = arith.constant 0 : index
    %3 = vector.load %arg3[%c0_3, %c0_4] : memref<1x32xf32, #tpu.memory_space<vmem>>, vector<1x32xf32>
    %4 = vector.broadcast %3 : vector<1x32xf32> to vector<2x32xf32>
    %5 = arith.addf %2, %4 : vector<2x32xf32>
    %6 = math.tanh %5 : vector<2x32xf32>
    %c0_5 = arith.constant 0 : index
    %c0_6 = arith.constant 0 : index
    %7 = vector.load %arg4[%c0_5, %c0_6] : memref<32x128xf32, #tpu.memory_space<vmem>>, vector<32x128xf32>
    %cst_7 = arith.constant dense<0.000000e+00> : vector<2x128xf32>
    %8 = tpu.matmul %6, %7, %cst_7 {dimension_numbers = #tpu.dot_dimension_numbers<[1], [0], [0], [1], [0, 0, 1, 1], [], []>} : vector<2x32xf32>, vector<32x128xf32>, vector<2x128xf32> -> vector<2x128xf32>
    %c0_8 = arith.constant 0 : index
    %c0_9 = arith.constant 0 : index
    %9 = vector.load %arg5[%c0_8, %c0_9] : memref<1x128xf32, #tpu.memory_space<vmem>>, vector<1x128xf32>
    %10 = vector.broadcast %9 : vector<1x128xf32> to vector<2x128xf32>
    %11 = arith.addf %8, %10 : vector<2x128xf32>
    %c0_10 = arith.constant 0 : index
    %c0_11 = arith.constant 0 : index
    %12 = vector.load %arg6[%c0_10, %c0_11] : memref<2x128xf32, #tpu.memory_space<vmem>>, vector<2x128xf32>
    tpu.vector_store %arg6[%c0_10, %c0_11], %11 {strides = array<i32>} : memref<2x128xf32, #tpu.memory_space<vmem>>, vector<2x128xf32>,
    return
  }
  func.func @transform_0(%arg0: i32) -> (i32, i32) {
    %c0_i32 = arith.constant 0 : i32
    %c0_i32_0 = arith.constant 0 : i32
    %c0_i32_1 = arith.constant 0 : i32
    return %c0_i32, %c0_i32_0 : i32, i32
  }
  func.func @transform_1(%arg0: i32) -> (i32, i32) {
    %c0_i32 = arith.constant 0 : i32
    %c0_i32_0 = arith.constant 0 : i32
    %c0_i32_1 = arith.constant 0 : i32
    return %c0_i32, %c0_i32_0 : i32, i32
  }
  func.func @transform_2(%arg0: i32) -> (i32, i32) {
    %c0_i32 = arith.constant 0 : i32
    %c0_i32_0 = arith.constant 0 : i32
    %c0_i32_1 = arith.constant 0 : i32
    return %c0_i32, %c0_i32_0 : i32, i32
  }
  func.func @transform_3(%arg0: i32) -> (i32, i32) {
    %c0_i32 = arith.constant 0 : i32
    %c0_i32_0 = arith.constant 0 : i32
    %c0_i32_1 = arith.constant 0 : i32
    return %c0_i32, %c0_i32_0 : i32, i32
  }
  func.func @transform_4(%arg0: i32) -> (i32, i32) {
    %c0_i32 = arith.constant 0 : i32
    %c0_i32_0 = arith.constant 0 : i32
    %c0_i32_1 = arith.constant 0 : i32
    return %c0_i32, %c0_i32_0 : i32, i32
  }
  func.func @transform_5(%arg0: i32) -> (i32, i32) {
    %c0_i32 = arith.constant 0 : i32
    %c0_i32_0 = arith.constant 0 : i32
    %c0_i32_1 = arith.constant 0 : i32
    return %c0_i32, %c0_i32_0 : i32, i32
  }
}

module attributes {stable_mosaic.version = 11 : i64} {
  func.func @_emb_ln_kernel(%arg0: i32, %arg1: memref<16x32xf32, #tpu.memory_space<vmem>>, %arg2: memref<1x32xf32, #tpu.memory_space<vmem>>, %arg3: memref<1x32xf32, #tpu.memory_space<vmem>>, %arg4: memref<16x32xf32, #tpu.memory_space<vmem>>) attributes {dimension_semantics = [#tpu.dimension_semantics<arbitrary>], iteration_bounds = array<i64: 1>, scalar_prefetch = 0 : i64, scratch_operands = 0 : i64, tpu.core_type = #tpu.core_type<tc>, window_params = [{pipeline_mode = #tpu.pipeline_mode<synchronous>, transform_indices = @transform_0, window_bounds = array<i64: 16, 32>}, {pipeline_mode = #tpu.pipeline_mode<synchronous>, transform_indices = @transform_1, window_bounds = array<i64: 1, 32>}, {pipeline_mode = #tpu.pipeline_mode<synchronous>, transform_indices = @transform_2, window_bounds = array<i64: 1, 32>}, {pipeline_mode = #tpu.pipeline_mode<synchronous>, transform_indices = @transform_3, window_bounds = array<i64: 16, 32>}]} {
    %c0 = arith.constant 0 : index
    %c0_0 = arith.constant 0 : index
    %0 = vector.load %arg1[%c0, %c0_0] : memref<16x32xf32, #tpu.memory_space<vmem>>, vector<16x32xf32>
    %c0_1 = arith.constant 0 : index
    %c0_2 = arith.constant 0 : index
    %1 = vector.load %arg2[%c0_1, %c0_2] : memref<1x32xf32, #tpu.memory_space<vmem>>, vector<1x32xf32>
    %c0_3 = arith.constant 0 : index
    %c0_4 = arith.constant 0 : index
    %2 = vector.load %arg3[%c0_3, %c0_4] : memref<1x32xf32, #tpu.memory_space<vmem>>, vector<1x32xf32>
    %cst = arith.constant dense<0.000000e+00> : vector<16xf32>
    %3 = vector.multi_reduction <add>, %0, %cst [1] : vector<16x32xf32> to vector<16xf32>
    %4 = vector.shape_cast %3 : vector<16xf32> to vector<16x1xf32>
    %cst_5 = arith.constant 3.200000e+01 : f32
    %5 = vector.broadcast %cst_5 : f32 to vector<16x1xf32>
    %6 = arith.divf %4, %5 : vector<16x1xf32>
    %7 = vector.broadcast %6 : vector<16x1xf32> to vector<16x32xf32>
    %8 = arith.subf %0, %7 : vector<16x32xf32>
    %9 = vector.broadcast %6 : vector<16x1xf32> to vector<16x32xf32>
    %10 = arith.subf %0, %9 : vector<16x32xf32>
    %11 = arith.mulf %8, %10 : vector<16x32xf32>
    %cst_6 = arith.constant dense<0.000000e+00> : vector<16xf32>
    %12 = vector.multi_reduction <add>, %11, %cst_6 [1] : vector<16x32xf32> to vector<16xf32>
    %13 = vector.shape_cast %12 : vector<16xf32> to vector<16x1xf32>
    %cst_7 = arith.constant 3.200000e+01 : f32
    %14 = vector.broadcast %cst_7 : f32 to vector<16x1xf32>
    %15 = arith.divf %13, %14 : vector<16x1xf32>
    %16 = vector.broadcast %6 : vector<16x1xf32> to vector<16x32xf32>
    %17 = arith.subf %0, %16 : vector<16x32xf32>
    %cst_8 = arith.constant 9.99999996E-13 : f32
    %18 = vector.broadcast %cst_8 : f32 to vector<16x1xf32>
    %19 = arith.addf %15, %18 : vector<16x1xf32>
    %20 = math.rsqrt %19 : vector<16x1xf32>
    %21 = vector.broadcast %20 : vector<16x1xf32> to vector<16x32xf32>
    %22 = arith.mulf %17, %21 : vector<16x32xf32>
    %23 = vector.broadcast %1 : vector<1x32xf32> to vector<16x32xf32>
    %24 = arith.mulf %22, %23 : vector<16x32xf32>
    %25 = vector.broadcast %2 : vector<1x32xf32> to vector<16x32xf32>
    %26 = arith.addf %24, %25 : vector<16x32xf32>
    %c0_9 = arith.constant 0 : index
    %c0_10 = arith.constant 0 : index
    %27 = vector.load %arg4[%c0_9, %c0_10] : memref<16x32xf32, #tpu.memory_space<vmem>>, vector<16x32xf32>
    tpu.vector_store %arg4[%c0_9, %c0_10], %26 {strides = array<i32>} : memref<16x32xf32, #tpu.memory_space<vmem>>, vector<16x32xf32>,
    return
  }
  func.func @transform_0(%arg0: i32) -> (i32, i32) {
    %c0_i32 = arith.constant 0 : i32
    %c0_i32_0 = arith.constant 0 : i32
    %c0_i32_1 = arith.constant 0 : i32
    return %c0_i32, %c0_i32_0 : i32, i32
  }
  func.func @transform_1(%arg0: i32) -> (i32, i32) {
    %c0_i32 = arith.constant 0 : i32
    %c0_i32_0 = arith.constant 0 : i32
    %c0_i32_1 = arith.constant 0 : i32
    return %c0_i32, %c0_i32_0 : i32, i32
  }
  func.func @transform_2(%arg0: i32) -> (i32, i32) {
    %c0_i32 = arith.constant 0 : i32
    %c0_i32_0 = arith.constant 0 : i32
    %c0_i32_1 = arith.constant 0 : i32
    return %c0_i32, %c0_i32_0 : i32, i32
  }
  func.func @transform_3(%arg0: i32) -> (i32, i32) {
    %c0_i32 = arith.constant 0 : i32
    %c0_i32_0 = arith.constant 0 : i32
    %c0_i32_1 = arith.constant 0 : i32
    return %c0_i32, %c0_i32_0 : i32, i32
  }
}

module attributes {stable_mosaic.version = 11 : i64} {
  func.func @_layer_kernel(%arg0: i32, %arg1: memref<16x32xf32, #tpu.memory_space<vmem>>, %arg2: memref<2x8xf32, #tpu.memory_space<vmem>>, %arg3: memref<32x96xf32, #tpu.memory_space<vmem>>, %arg4: memref<1x96xf32, #tpu.memory_space<vmem>>, %arg5: memref<32x32xf32, #tpu.memory_space<vmem>>, %arg6: memref<1x32xf32, #tpu.memory_space<vmem>>, %arg7: memref<1x32xf32, #tpu.memory_space<vmem>>, %arg8: memref<1x32xf32, #tpu.memory_space<vmem>>, %arg9: memref<32x64xf32, #tpu.memory_space<vmem>>, %arg10: memref<1x64xf32, #tpu.memory_space<vmem>>, %arg11: memref<64x32xf32, #tpu.memory_space<vmem>>, %arg12: memref<1x32xf32, #tpu.memory_space<vmem>>, %arg13: memref<1x32xf32, #tpu.memory_space<vmem>>, %arg14: memref<1x32xf32, #tpu.memory_space<vmem>>, %arg15: memref<16x32xf32, #tpu.memory_space<vmem>>, %arg16: memref<16x32xf32, #tpu.memory_space<vmem>>) attributes {dimension_semantics = [#tpu.dimension_semantics<arbitrary>], iteration_bounds = array<i64: 1>, scalar_prefetch = 0 : i64, scratch_operands = 1 : i64, tpu.core_type = #tpu.core_type<tc>, window_params = [{pipeline_mode = #tpu.pipeline_mode<synchronous>, transform_indices = @transform_0, window_bounds = array<i64: 16, 32>}, {pipeline_mode = #tpu.pipeline_mode<synchronous>, transform_indices = @transform_1, window_bounds = array<i64: 2, 8>}, {pipeline_mode = #tpu.pipeline_mode<synchronous>, transform_indices = @transform_2, window_bounds = array<i64: 32, 96>}, {pipeline_mode = #tpu.pipeline_mode<synchronous>, transform_indices = @transform_3, window_bounds = array<i64: 1, 96>}, {pipeline_mode = #tpu.pipeline_mode<synchronous>, transform_indices = @transform_4, window_bounds = array<i64: 32, 32>}, {pipeline_mode = #tpu.pipeline_mode<synchronous>, transform_indices = @transform_5, window_bounds = array<i64: 1, 32>}, {pipeline_mode = #tpu.pipeline_mode<synchronous>, transform_indices = @transform_6, window_bounds = array<i64: 1, 32>}, {pipeline_mode = #tpu.pipeline_mode<synchronous>, transform_indices = @transform_7, window_bounds = array<i64: 1, 32>}, {pipeline_mode = #tpu.pipeline_mode<synchronous>, transform_indices = @transform_8, window_bounds = array<i64: 32, 64>}, {pipeline_mode = #tpu.pipeline_mode<synchronous>, transform_indices = @transform_9, window_bounds = array<i64: 1, 64>}, {pipeline_mode = #tpu.pipeline_mode<synchronous>, transform_indices = @transform_10, window_bounds = array<i64: 64, 32>}, {pipeline_mode = #tpu.pipeline_mode<synchronous>, transform_indices = @transform_11, window_bounds = array<i64: 1, 32>}, {pipeline_mode = #tpu.pipeline_mode<synchronous>, transform_indices = @transform_12, window_bounds = array<i64: 1, 32>}, {pipeline_mode = #tpu.pipeline_mode<synchronous>, transform_indices = @transform_13, window_bounds = array<i64: 1, 32>}, {pipeline_mode = #tpu.pipeline_mode<synchronous>, transform_indices = @transform_14, window_bounds = array<i64: 16, 32>}]} {
    %c0 = arith.constant 0 : index
    %c0_0 = arith.constant 0 : index
    %0 = vector.load %arg1[%c0, %c0_0] : memref<16x32xf32, #tpu.memory_space<vmem>>, vector<16x32xf32>
    %c0_1 = arith.constant 0 : index
    %c0_2 = arith.constant 0 : index
    %1 = vector.load %arg2[%c0_1, %c0_2] : memref<2x8xf32, #tpu.memory_space<vmem>>, vector<2x8xf32>
    %c0_3 = arith.constant 0 : index
    %c0_4 = arith.constant 0 : index
    %2 = vector.load %arg3[%c0_3, %c0_4] : memref<32x96xf32, #tpu.memory_space<vmem>>, vector<32x96xf32>
    %cst = arith.constant dense<0.000000e+00> : vector<16x96xf32>
    %3 = tpu.matmul %0, %2, %cst {dimension_numbers = #tpu.dot_dimension_numbers<[1], [0], [0], [1], [0, 0, 1, 1], [], []>} : vector<16x32xf32>, vector<32x96xf32>, vector<16x96xf32> -> vector<16x96xf32>
    %c0_5 = arith.constant 0 : index
    %c0_6 = arith.constant 0 : index
    %4 = vector.load %arg4[%c0_5, %c0_6] : memref<1x96xf32, #tpu.memory_space<vmem>>, vector<1x96xf32>
    %5 = vector.broadcast %4 : vector<1x96xf32> to vector<16x96xf32>
    %6 = arith.addf %3, %5 : vector<16x96xf32>
    %7 = vector.extract_strided_slice %6 {offsets = [0, 0], sizes = [16, 32], strides = [1, 1]} : vector<16x96xf32> to vector<16x32xf32>
    %8 = vector.extract_strided_slice %6 {offsets = [0, 32], sizes = [16, 32], strides = [1, 1]} : vector<16x96xf32> to vector<16x32xf32>
    %9 = vector.extract_strided_slice %6 {offsets = [0, 64], sizes = [16, 32], strides = [1, 1]} : vector<16x96xf32> to vector<16x32xf32>
    %10 = vector.extract_strided_slice %1 {offsets = [0, 0], sizes = [1, 8], strides = [1, 1]} : vector<2x8xf32> to vector<1x8xf32>
    %11 = vector.extract_strided_slice %7 {offsets = [0, 0], sizes = [8, 16], strides = [1, 1]} : vector<16x32xf32> to vector<8x16xf32>
    %12 = vector.extract_strided_slice %8 {offsets = [0, 0], sizes = [8, 16], strides = [1, 1]} : vector<16x32xf32> to vector<8x16xf32>
    %13 = vector.extract_strided_slice %9 {offsets = [0, 0], sizes = [8, 16], strides = [1, 1]} : vector<16x32xf32> to vector<8x16xf32>
    %cst_7 = arith.constant dense<0.000000e+00> : vector<8x8xf32>
    %14 = tpu.matmul %11, %12, %cst_7 {dimension_numbers = #tpu.dot_dimension_numbers<[1], [1], [0], [0], [0, 0, 1, 0], [], []>} : vector<8x16xf32>, vector<8x16xf32>, vector<8x8xf32> -> vector<8x8xf32>
    %cst_8 = arith.constant 2.500000e-01 : f32
    %15 = vector.broadcast %cst_8 : f32 to vector<8x8xf32>
    %16 = arith.mulf %14, %15 : vector<8x8xf32>
    %17 = vector.broadcast %10 : vector<1x8xf32> to vector<8x8xf32>
    %18 = arith.addf %16, %17 : vector<8x8xf32>
    %cst_9 = arith.constant dense<0xFF800000> : vector<8xf32>
    %19 = vector.multi_reduction <maximumf>, %18, %cst_9 [1] : vector<8x8xf32> to vector<8xf32>
    %20 = vector.shape_cast %19 : vector<8xf32> to vector<8x1xf32>
    %21 = vector.broadcast %20 : vector<8x1xf32> to vector<8x8xf32>
    %22 = arith.subf %18, %21 : vector<8x8xf32>
    %23 = math.exp %22 : vector<8x8xf32>
    %cst_10 = arith.constant dense<0.000000e+00> : vector<8xf32>
    %24 = vector.multi_reduction <add>, %23, %cst_10 [1] : vector<8x8xf32> to vector<8xf32>
    %25 = vector.shape_cast %24 : vector<8xf32> to vector<8x1xf32>
    %26 = tpu.reciprocal %25 {approx = true} : vector<8x1xf32> -> vector<8x1xf32>
    %27 = vector.broadcast %26 : vector<8x1xf32> to vector<8x8xf32>
    %28 = arith.mulf %23, %27 : vector<8x8xf32>
    %cst_11 = arith.constant dense<0.000000e+00> : vector<8x16xf32>
    %29 = tpu.matmul %28, %13, %cst_11 {dimension_numbers = #tpu.dot_dimension_numbers<[1], [0], [0], [1], [0, 0, 1, 1], [], []>} : vector<8x8xf32>, vector<8x16xf32>, vector<8x16xf32> -> vector<8x16xf32>
    %c0_12 = arith.constant 0 : index
    %c0_13 = arith.constant 0 : index
    %30 = vector.load %arg16[%c0_12, %c0_13] : memref<16x32xf32, #tpu.memory_space<vmem>>, vector<8x16xf32>
    tpu.vector_store %arg16[%c0_12, %c0_13], %29 {strides = array<i32>} : memref<16x32xf32, #tpu.memory_space<vmem>>, vector<8x16xf32>,
    %31 = vector.extract_strided_slice %7 {offsets = [0, 16], sizes = [8, 16], strides = [1, 1]} : vector<16x32xf32> to vector<8x16xf32>
    %32 = vector.extract_strided_slice %8 {offsets = [0, 16], sizes = [8, 16], strides = [1, 1]} : vector<16x32xf32> to vector<8x16xf32>
    %33 = vector.extract_strided_slice %9 {offsets = [0, 16], sizes = [8, 16], strides = [1, 1]} : vector<16x32xf32> to vector<8x16xf32>
    %cst_14 = arith.constant dense<0.000000e+00> : vector<8x8xf32>
    %34 = tpu.matmul %31, %32, %cst_14 {dimension_numbers = #tpu.dot_dimension_numbers<[1], [1], [0], [0], [0, 0, 1, 0], [], []>} : vector<8x16xf32>, vector<8x16xf32>, vector<8x8xf32> -> vector<8x8xf32>
    %cst_15 = arith.constant 2.500000e-01 : f32
    %35 = vector.broadcast %cst_15 : f32 to vector<8x8xf32>
    %36 = arith.mulf %34, %35 : vector<8x8xf32>
    %37 = vector.broadcast %10 : vector<1x8xf32> to vector<8x8xf32>
    %38 = arith.addf %36, %37 : vector<8x8xf32>
    %cst_16 = arith.constant dense<0xFF800000> : vector<8xf32>
    %39 = vector.multi_reduction <maximumf>, %38, %cst_16 [1] : vector<8x8xf32> to vector<8xf32>
    %40 = vector.shape_cast %39 : vector<8xf32> to vector<8x1xf32>
    %41 = vector.broadcast %40 : vector<8x1xf32> to vector<8x8xf32>
    %42 = arith.subf %38, %41 : vector<8x8xf32>
    %43 = math.exp %42 : vector<8x8xf32>
    %cst_17 = arith.constant dense<0.000000e+00> : vector<8xf32>
    %44 = vector.multi_reduction <add>, %43, %cst_17 [1] : vector<8x8xf32> to vector<8xf32>
    %45 = vector.shape_cast %44 : vector<8xf32> to vector<8x1xf32>
    %46 = tpu.reciprocal %45 {approx = true} : vector<8x1xf32> -> vector<8x1xf32>
    %47 = vector.broadcast %46 : vector<8x1xf32> to vector<8x8xf32>
    %48 = arith.mulf %43, %47 : vector<8x8xf32>
    %cst_18 = arith.constant dense<0.000000e+00> : vector<8x16xf32>
    %49 = tpu.matmul %48, %33, %cst_18 {dimension_numbers = #tpu.dot_dimension_numbers<[1], [0], [0], [1], [0, 0, 1, 1], [], []>} : vector<8x8xf32>, vector<8x16xf32>, vector<8x16xf32> -> vector<8x16xf32>
    %c0_19 = arith.constant 0 : index
    %c16 = arith.constant 16 : index
    %50 = vector.load %arg16[%c0_19, %c16] : memref<16x32xf32, #tpu.memory_space<vmem>>, vector<8x16xf32>
    tpu.vector_store %arg16[%c0_19, %c16], %49 {strides = array<i32>} : memref<16x32xf32, #tpu.memory_space<vmem>>, vector<8x16xf32>,
    %51 = vector.extract_strided_slice %1 {offsets = [1, 0], sizes = [1, 8], strides = [1, 1]} : vector<2x8xf32> to vector<1x8xf32>
    %52 = vector.extract_strided_slice %7 {offsets = [8, 0], sizes = [8, 16], strides = [1, 1]} : vector<16x32xf32> to vector<8x16xf32>
    %53 = vector.extract_strided_slice %8 {offsets = [8, 0], sizes = [8, 16], strides = [1, 1]} : vector<16x32xf32> to vector<8x16xf32>
    %54 = vector.extract_strided_slice %9 {offsets = [8, 0], sizes = [8, 16], strides = [1, 1]} : vector<16x32xf32> to vector<8x16xf32>
    %cst_20 = arith.constant dense<0.000000e+00> : vector<8x8xf32>
    %55 = tpu.matmul %52, %53, %cst_20 {dimension_numbers = #tpu.dot_dimension_numbers<[1], [1], [0], [0], [0, 0, 1, 0], [], []>} : vector<8x16xf32>, vector<8x16xf32>, vector<8x8xf32> -> vector<8x8xf32>
    %cst_21 = arith.constant 2.500000e-01 : f32
    %56 = vector.broadcast %cst_21 : f32 to vector<8x8xf32>
    %57 = arith.mulf %55, %56 : vector<8x8xf32>
    %58 = vector.broadcast %51 : vector<1x8xf32> to vector<8x8xf32>
    %59 = arith.addf %57, %58 : vector<8x8xf32>
    %cst_22 = arith.constant dense<0xFF800000> : vector<8xf32>
    %60 = vector.multi_reduction <maximumf>, %59, %cst_22 [1] : vector<8x8xf32> to vector<8xf32>
    %61 = vector.shape_cast %60 : vector<8xf32> to vector<8x1xf32>
    %62 = vector.broadcast %61 : vector<8x1xf32> to vector<8x8xf32>
    %63 = arith.subf %59, %62 : vector<8x8xf32>
    %64 = math.exp %63 : vector<8x8xf32>
    %cst_23 = arith.constant dense<0.000000e+00> : vector<8xf32>
    %65 = vector.multi_reduction <add>, %64, %cst_23 [1] : vector<8x8xf32> to vector<8xf32>
    %66 = vector.shape_cast %65 : vector<8xf32> to vector<8x1xf32>
    %67 = tpu.reciprocal %66 {approx = true} : vector<8x1xf32> -> vector<8x1xf32>
    %68 = vector.broadcast %67 : vector<8x1xf32> to vector<8x8xf32>
    %69 = arith.mulf %64, %68 : vector<8x8xf32>
    %cst_24 = arith.constant dense<0.000000e+00> : vector<8x16xf32>
    %70 = tpu.matmul %69, %54, %cst_24 {dimension_numbers = #tpu.dot_dimension_numbers<[1], [0], [0], [1], [0, 0, 1, 1], [], []>} : vector<8x8xf32>, vector<8x16xf32>, vector<8x16xf32> -> vector<8x16xf32>
    %c8 = arith.constant 8 : index
    %c0_25 = arith.constant 0 : index
    %71 = vector.load %arg16[%c8, %c0_25] : memref<16x32xf32, #tpu.memory_space<vmem>>, vector<8x16xf32>
    tpu.vector_store %arg16[%c8, %c0_25], %70 {strides = array<i32>} : memref<16x32xf32, #tpu.memory_space<vmem>>, vector<8x16xf32>,
    %72 = vector.extract_strided_slice %7 {offsets = [8, 16], sizes = [8, 16], strides = [1, 1]} : vector<16x32xf32> to vector<8x16xf32>
    %73 = vector.extract_strided_slice %8 {offsets = [8, 16], sizes = [8, 16], strides = [1, 1]} : vector<16x32xf32> to vector<8x16xf32>
    %74 = vector.extract_strided_slice %9 {offsets = [8, 16], sizes = [8, 16], strides = [1, 1]} : vector<16x32xf32> to vector<8x16xf32>
    %cst_26 = arith.constant dense<0.000000e+00> : vector<8x8xf32>
    %75 = tpu.matmul %72, %73, %cst_26 {dimension_numbers = #tpu.dot_dimension_numbers<[1], [1], [0], [0], [0, 0, 1, 0], [], []>} : vector<8x16xf32>, vector<8x16xf32>, vector<8x8xf32> -> vector<8x8xf32>
    %cst_27 = arith.constant 2.500000e-01 : f32
    %76 = vector.broadcast %cst_27 : f32 to vector<8x8xf32>
    %77 = arith.mulf %75, %76 : vector<8x8xf32>
    %78 = vector.broadcast %51 : vector<1x8xf32> to vector<8x8xf32>
    %79 = arith.addf %77, %78 : vector<8x8xf32>
    %cst_28 = arith.constant dense<0xFF800000> : vector<8xf32>
    %80 = vector.multi_reduction <maximumf>, %79, %cst_28 [1] : vector<8x8xf32> to vector<8xf32>
    %81 = vector.shape_cast %80 : vector<8xf32> to vector<8x1xf32>
    %82 = vector.broadcast %81 : vector<8x1xf32> to vector<8x8xf32>
    %83 = arith.subf %79, %82 : vector<8x8xf32>
    %84 = math.exp %83 : vector<8x8xf32>
    %cst_29 = arith.constant dense<0.000000e+00> : vector<8xf32>
    %85 = vector.multi_reduction <add>, %84, %cst_29 [1] : vector<8x8xf32> to vector<8xf32>
    %86 = vector.shape_cast %85 : vector<8xf32> to vector<8x1xf32>
    %87 = tpu.reciprocal %86 {approx = true} : vector<8x1xf32> -> vector<8x1xf32>
    %88 = vector.broadcast %87 : vector<8x1xf32> to vector<8x8xf32>
    %89 = arith.mulf %84, %88 : vector<8x8xf32>
    %cst_30 = arith.constant dense<0.000000e+00> : vector<8x16xf32>
    %90 = tpu.matmul %89, %74, %cst_30 {dimension_numbers = #tpu.dot_dimension_numbers<[1], [0], [0], [1], [0, 0, 1, 1], [], []>} : vector<8x8xf32>, vector<8x16xf32>, vector<8x16xf32> -> vector<8x16xf32>
    %c8_31 = arith.constant 8 : index
    %c16_32 = arith.constant 16 : index
    %91 = vector.load %arg16[%c8_31, %c16_32] : memref<16x32xf32, #tpu.memory_space<vmem>>, vector<8x16xf32>
    tpu.vector_store %arg16[%c8_31, %c16_32], %90 {strides = array<i32>} : memref<16x32xf32, #tpu.memory_space<vmem>>, vector<8x16xf32>,
    %c0_33 = arith.constant 0 : index
    %c0_34 = arith.constant 0 : index
    %92 = vector.load %arg16[%c0_33, %c0_34] : memref<16x32xf32, #tpu.memory_space<vmem>>, vector<16x32xf32>
    %c0_35 = arith.constant 0 : index
    %c0_36 = arith.constant 0 : index
    %93 = vector.load %arg5[%c0_35, %c0_36] : memref<32x32xf32, #tpu.memory_space<vmem>>, vector<32x32xf32>
    %cst_37 = arith.constant dense<0.000000e+00> : vector<16x32xf32>
    %94 = tpu.matmul %92, %93, %cst_37 {dimension_numbers = #tpu.dot_dimension_numbers<[1], [0], [0], [1], [0, 0, 1, 1], [], []>} : vector<16x32xf32>, vector<32x32xf32>, vector<16x32xf32> -> vector<16x32xf32>
    %c0_38 = arith.constant 0 : index
    %c0_39 = arith.constant 0 : index
    %95 = vector.load %arg6[%c0_38, %c0_39] : memref<1x32xf32, #tpu.memory_space<vmem>>, vector<1x32xf32>
    %96 = vector.broadcast %95 : vector<1x32xf32> to vector<16x32xf32>
    %97 = arith.addf %94, %96 : vector<16x32xf32>
    %98 = arith.addf %0, %97 : vector<16x32xf32>
    %c0_40 = arith.constant 0 : index
    %c0_41 = arith.constant 0 : index
    %99 = vector.load %arg7[%c0_40, %c0_41] : memref<1x32xf32, #tpu.memory_space<vmem>>, vector<1x32xf32>
    %c0_42 = arith.constant 0 : index
    %c0_43 = arith.constant 0 : index
    %100 = vector.load %arg8[%c0_42, %c0_43] : memref<1x32xf32, #tpu.memory_space<vmem>>, vector<1x32xf32>
    %cst_44 = arith.constant dense<0.000000e+00> : vector<16xf32>
    %101 = vector.multi_reduction <add>, %98, %cst_44 [1] : vector<16x32xf32> to vector<16xf32>
    %102 = vector.shape_cast %101 : vector<16xf32> to vector<16x1xf32>
    %cst_45 = arith.constant 3.200000e+01 : f32
    %103 = vector.broadcast %cst_45 : f32 to vector<16x1xf32>
    %104 = arith.divf %102, %103 : vector<16x1xf32>
    %105 = vector.broadcast %104 : vector<16x1xf32> to vector<16x32xf32>
    %106 = arith.subf %98, %105 : vector<16x32xf32>
    %107 = vector.broadcast %104 : vector<16x1xf32> to vector<16x32xf32>
    %108 = arith.subf %98, %107 : vector<16x32xf32>
    %109 = arith.mulf %106, %108 : vector<16x32xf32>
    %cst_46 = arith.constant dense<0.000000e+00> : vector<16xf32>
    %110 = vector.multi_reduction <add>, %109, %cst_46 [1] : vector<16x32xf32> to vector<16xf32>
    %111 = vector.shape_cast %110 : vector<16xf32> to vector<16x1xf32>
    %cst_47 = arith.constant 3.200000e+01 : f32
    %112 = vector.broadcast %cst_47 : f32 to vector<16x1xf32>
    %113 = arith.divf %111, %112 : vector<16x1xf32>
    %114 = vector.broadcast %104 : vector<16x1xf32> to vector<16x32xf32>
    %115 = arith.subf %98, %114 : vector<16x32xf32>
    %cst_48 = arith.constant 9.99999996E-13 : f32
    %116 = vector.broadcast %cst_48 : f32 to vector<16x1xf32>
    %117 = arith.addf %113, %116 : vector<16x1xf32>
    %118 = math.rsqrt %117 : vector<16x1xf32>
    %119 = vector.broadcast %118 : vector<16x1xf32> to vector<16x32xf32>
    %120 = arith.mulf %115, %119 : vector<16x32xf32>
    %121 = vector.broadcast %99 : vector<1x32xf32> to vector<16x32xf32>
    %122 = arith.mulf %120, %121 : vector<16x32xf32>
    %123 = vector.broadcast %100 : vector<1x32xf32> to vector<16x32xf32>
    %124 = arith.addf %122, %123 : vector<16x32xf32>
    %c0_49 = arith.constant 0 : index
    %c0_50 = arith.constant 0 : index
    %125 = vector.load %arg9[%c0_49, %c0_50] : memref<32x64xf32, #tpu.memory_space<vmem>>, vector<32x64xf32>
    %cst_51 = arith.constant dense<0.000000e+00> : vector<16x64xf32>
    %126 = tpu.matmul %124, %125, %cst_51 {dimension_numbers = #tpu.dot_dimension_numbers<[1], [0], [0], [1], [0, 0, 1, 1], [], []>} : vector<16x32xf32>, vector<32x64xf32>, vector<16x64xf32> -> vector<16x64xf32>
    %c0_52 = arith.constant 0 : index
    %c0_53 = arith.constant 0 : index
    %127 = vector.load %arg10[%c0_52, %c0_53] : memref<1x64xf32, #tpu.memory_space<vmem>>, vector<1x64xf32>
    %128 = vector.broadcast %127 : vector<1x64xf32> to vector<16x64xf32>
    %129 = arith.addf %126, %128 : vector<16x64xf32>
    %cst_54 = arith.constant 5.000000e-01 : f32
    %130 = vector.broadcast %cst_54 : f32 to vector<16x64xf32>
    %131 = arith.mulf %130, %129 : vector<16x64xf32>
    %cst_55 = arith.constant 0.707106769 : f32
    %132 = vector.broadcast %cst_55 : f32 to vector<16x64xf32>
    %133 = arith.mulf %129, %132 : vector<16x64xf32>
    %134 = math.erf %133 : vector<16x64xf32>
    %cst_56 = arith.constant 1.000000e+00 : f32
    %135 = vector.broadcast %cst_56 : f32 to vector<16x64xf32>
    %136 = arith.addf %135, %134 : vector<16x64xf32>
    %137 = arith.mulf %131, %136 : vector<16x64xf32>
    %c0_57 = arith.constant 0 : index
    %c0_58 = arith.constant 0 : index
    %138 = vector.load %arg11[%c0_57, %c0_58] : memref<64x32xf32, #tpu.memory_space<vmem>>, vector<64x32xf32>
    %cst_59 = arith.constant dense<0.000000e+00> : vector<16x32xf32>
    %139 = tpu.matmul %137, %138, %cst_59 {dimension_numbers = #tpu.dot_dimension_numbers<[1], [0], [0], [1], [0, 0, 1, 1], [], []>} : vector<16x64xf32>, vector<64x32xf32>, vector<16x32xf32> -> vector<16x32xf32>
    %c0_60 = arith.constant 0 : index
    %c0_61 = arith.constant 0 : index
    %140 = vector.load %arg12[%c0_60, %c0_61] : memref<1x32xf32, #tpu.memory_space<vmem>>, vector<1x32xf32>
    %141 = vector.broadcast %140 : vector<1x32xf32> to vector<16x32xf32>
    %142 = arith.addf %139, %141 : vector<16x32xf32>
    %143 = arith.addf %124, %142 : vector<16x32xf32>
    %c0_62 = arith.constant 0 : index
    %c0_63 = arith.constant 0 : index
    %144 = vector.load %arg13[%c0_62, %c0_63] : memref<1x32xf32, #tpu.memory_space<vmem>>, vector<1x32xf32>
    %c0_64 = arith.constant 0 : index
    %c0_65 = arith.constant 0 : index
    %145 = vector.load %arg14[%c0_64, %c0_65] : memref<1x32xf32, #tpu.memory_space<vmem>>, vector<1x32xf32>
    %cst_66 = arith.constant dense<0.000000e+00> : vector<16xf32>
    %146 = vector.multi_reduction <add>, %143, %cst_66 [1] : vector<16x32xf32> to vector<16xf32>
    %147 = vector.shape_cast %146 : vector<16xf32> to vector<16x1xf32>
    %cst_67 = arith.constant 3.200000e+01 : f32
    %148 = vector.broadcast %cst_67 : f32 to vector<16x1xf32>
    %149 = arith.divf %147, %148 : vector<16x1xf32>
    %150 = vector.broadcast %149 : vector<16x1xf32> to vector<16x32xf32>
    %151 = arith.subf %143, %150 : vector<16x32xf32>
    %152 = vector.broadcast %149 : vector<16x1xf32> to vector<16x32xf32>
    %153 = arith.subf %143, %152 : vector<16x32xf32>
    %154 = arith.mulf %151, %153 : vector<16x32xf32>
    %cst_68 = arith.constant dense<0.000000e+00> : vector<16xf32>
    %155 = vector.multi_reduction <add>, %154, %cst_68 [1] : vector<16x32xf32> to vector<16xf32>
    %156 = vector.shape_cast %155 : vector<16xf32> to vector<16x1xf32>
    %cst_69 = arith.constant 3.200000e+01 : f32
    %157 = vector.broadcast %cst_69 : f32 to vector<16x1xf32>
    %158 = arith.divf %156, %157 : vector<16x1xf32>
    %159 = vector.broadcast %149 : vector<16x1xf32> to vector<16x32xf32>
    %160 = arith.subf %143, %159 : vector<16x32xf32>
    %cst_70 = arith.constant 9.99999996E-13 : f32
    %161 = vector.broadcast %cst_70 : f32 to vector<16x1xf32>
    %162 = arith.addf %158, %161 : vector<16x1xf32>
    %163 = math.rsqrt %162 : vector<16x1xf32>
    %164 = vector.broadcast %163 : vector<16x1xf32> to vector<16x32xf32>
    %165 = arith.mulf %160, %164 : vector<16x32xf32>
    %166 = vector.broadcast %144 : vector<1x32xf32> to vector<16x32xf32>
    %167 = arith.mulf %165, %166 : vector<16x32xf32>
    %168 = vector.broadcast %145 : vector<1x32xf32> to vector<16x32xf32>
    %169 = arith.addf %167, %168 : vector<16x32xf32>
    %c0_71 = arith.constant 0 : index
    %c0_72 = arith.constant 0 : index
    %170 = vector.load %arg15[%c0_71, %c0_72] : memref<16x32xf32, #tpu.memory_space<vmem>>, vector<16x32xf32>
    tpu.vector_store %arg15[%c0_71, %c0_72], %169 {strides = array<i32>} : memref<16x32xf32, #tpu.memory_space<vmem>>, vector<16x32xf32>,
    return
  }
  func.func @transform_0(%arg0: i32) -> (i32, i32) {
    %c0_i32 = arith.constant 0 : i32
    %c0_i32_0 = arith.constant 0 : i32
    %c0_i32_1 = arith.constant 0 : i32
    return %c0_i32, %c0_i32_0 : i32, i32
  }
  func.func @transform_1(%arg0: i32) -> (i32, i32) {
    %c0_i32 = arith.constant 0 : i32
    %c0_i32_0 = arith.constant 0 : i32
    %c0_i32_1 = arith.constant 0 : i32
    return %c0_i32, %c0_i32_0 : i32, i32
  }
  func.func @transform_2(%arg0: i32) -> (i32, i32) {
    %c0_i32 = arith.constant 0 : i32
    %c0_i32_0 = arith.constant 0 : i32
    %c0_i32_1 = arith.constant 0 : i32
    return %c0_i32, %c0_i32_0 : i32, i32
  }
  func.func @transform_3(%arg0: i32) -> (i32, i32) {
    %c0_i32 = arith.constant 0 : i32
    %c0_i32_0 = arith.constant 0 : i32
    %c0_i32_1 = arith.constant 0 : i32
    return %c0_i32, %c0_i32_0 : i32, i32
  }
  func.func @transform_4(%arg0: i32) -> (i32, i32) {
    %c0_i32 = arith.constant 0 : i32
    %c0_i32_0 = arith.constant 0 : i32
    %c0_i32_1 = arith.constant 0 : i32
    return %c0_i32, %c0_i32_0 : i32, i32
  }
  func.func @transform_5(%arg0: i32) -> (i32, i32) {
    %c0_i32 = arith.constant 0 : i32
    %c0_i32_0 = arith.constant 0 : i32
    %c0_i32_1 = arith.constant 0 : i32
    return %c0_i32, %c0_i32_0 : i32, i32
  }
  func.func @transform_6(%arg0: i32) -> (i32, i32) {
    %c0_i32 = arith.constant 0 : i32
    %c0_i32_0 = arith.constant 0 : i32
    %c0_i32_1 = arith.constant 0 : i32
    return %c0_i32, %c0_i32_0 : i32, i32
  }
  func.func @transform_7(%arg0: i32) -> (i32, i32) {
    %c0_i32 = arith.constant 0 : i32
    %c0_i32_0 = arith.constant 0 : i32
    %c0_i32_1 = arith.constant 0 : i32
    return %c0_i32, %c0_i32_0 : i32, i32
  }
  func.func @transform_8(%arg0: i32) -> (i32, i32) {
    %c0_i32 = arith.constant 0 : i32
    %c0_i32_0 = arith.constant 0 : i32
    %c0_i32_1 = arith.constant 0 : i32
    return %c0_i32, %c0_i32_0 : i32, i32
  }
  func.func @transform_9(%arg0: i32) -> (i32, i32) {
    %c0_i32 = arith.constant 0 : i32
    %c0_i32_0 = arith.constant 0 : i32
    %c0_i32_1 = arith.constant 0 : i32
    return %c0_i32, %c0_i32_0 : i32, i32
  }
  func.func @transform_10(%arg0: i32) -> (i32, i32) {
    %c0_i32 = arith.constant 0 : i32
    %c0_i32_0 = arith.constant 0 : i32
    %c0_i32_1 = arith.constant 0 : i32
    return %c0_i32, %c0_i32_0 : i32, i32
  }
  func.func @transform_11(%arg0: i32) -> (i32, i32) {
    %c0_i32 = arith.constant 0 : i32
    %c0_i32_0 = arith.constant 0 : i32
    %c0_i32_1 = arith.constant 0 : i32
    return %c0_i32, %c0_i32_0 : i32, i32
  }
  func.func @transform_12(%arg0: i32) -> (i32, i32) {
    %c0_i32 = arith.constant 0 : i32
    %c0_i32_0 = arith.constant 0 : i32
    %c0_i32_1 = arith.constant 0 : i32
    return %c0_i32, %c0_i32_0 : i32, i32
  }
  func.func @transform_13(%arg0: i32) -> (i32, i32) {
    %c0_i32 = arith.constant 0 : i32
    %c0_i32_0 = arith.constant 0 : i32
    %c0_i32_1 = arith.constant 0 : i32
    return %c0_i32, %c0_i32_0 : i32, i32
  }
  func.func @transform_14(%arg0: i32) -> (i32, i32) {
    %c0_i32 = arith.constant 0 : i32
    %c0_i32_0 = arith.constant 0 : i32
    %c0_i32_1 = arith.constant 0 : i32
    return %c0_i32, %c0_i32_0 : i32, i32
  }
}

</mosaic_0001>

<bundles_post_ra>
// kernel: _lambda_.4
= control target key start
LH: loop header
LB: loop body
LE: loop exit
PB: predicated region body
PF: predicated region fallthrough
CT: control target
= control target key end

     0   :  { %vm18_vm0 = vcmask 261120   ;;  %v95_v4 = vmov 32.0   ;;  %s140_s0 = inlined_call_operand.vmem [shape: f32[16,32], index: 0, kind: input, shape index: {}]   ;;  %s141_s1 = inlined_call_operand.vmem [shape: f32[1,32], index: 1, kind: input, shape index: {}]   ;;  %s142_s2 = inlined_call_operand.vmem [shape: f32[1,32], index: 2, kind: input, shape index: {}]   ;;  %s143_s3 = inlined_call_operand.vmem [shape: f32[16,32], index: 3, kind: output, shape index: {}]  }
   0x1   :  { %v14_v0 = vld [vmem:[%s140_s0] sm:$0xff]  ;;  %v15_v2 = vld [vmem:[%s140_s0 + $0x8] sm:$0xff]  ;;  %89 = vrcp.f32 %v95_v4 }
   0x2   :  { %v19_v1 = vsel %vm18_vm0, %v14_v0, 0.0  ;;  %v22_v3 = vsel %vm18_vm0, %v15_v2, 0.0  ;;  %v87_v35 = vld [vmem:[%s141_s1] ss:$0 sm:$0xff] }
   0x3   :  { %20 = vadd.xlane.f32.xlu0 %v19_v1  ;;  %v88_v38 = vld [vmem:[%s142_s2] ss:$0 sm:$0xff] }
   0x7   :  { %v90_v5 = vpop.eup %89 }
   0x8   :  { %v26_v6 = vmul.f32 32.0, %v90_v5  ;;  %vm30_vm1 = vweird.f32 %v90_v5 }
   0xa   :  { %v27_v7 = vsub.f32 1.0, %v26_v6 }
   0xb   :  { %23 = vadd.xlane.f32.xlu0 %v22_v3 }
   0xc   :  { %v28_v8 = vmul.f32 %v90_v5, %v27_v7 }
   0xe   :  { %v29_v9 = vadd.f32 %v90_v5, %v28_v8 }
  0x10   :  { %v31_v10 = vsel %vm30_vm1, %v90_v5, %v29_v9 }
  0x76   :  { %v21_v11 = vpop.xlane.xlu0 %20 }
  0x77   :  { %v32_v12 = vmul.f32 %v31_v10, %v21_v11 }
  0x79   :  { %v34_v13 = vsub.f32 %v14_v0, %v32_v12 }
  0x7b   :  { %v36_v14 = vmul.f32 %v34_v13, %v34_v13 }
  0x7d   :  { %v38_v15 = vsel %vm18_vm0, %v36_v14, 0.0 }
  0x7e   :  { %39 = vadd.xlane.f32.xlu1 %v38_v15  ;;  %v24_v16 = vpop.xlane.xlu0 %23 }
  0x7f   :  { %v33_v17 = vmul.f32 %v31_v10, %v24_v16 }
  0x81   :  { %v35_v18 = vsub.f32 %v15_v2, %v33_v17 }
  0x83   :  { %v37_v19 = vmul.f32 %v35_v18, %v35_v18 }
  0x85   :  { %v41_v20 = vsel %vm18_vm0, %v37_v19, 0.0 }
  0x86   :  { %42 = vadd.xlane.f32.xlu1 %v41_v20 }
  0xf1   :  { %v40_v21 = vpop.xlane.xlu1 %39 }
  0xf2   :  { %v44_v22 = vmul.f32 %v40_v21, %v31_v10 }
  0xf4   :  { %v46_v23 = vadd.f32 1e-12, %v44_v22 }
  0xf6   :  { %91 = vrsqrt.f32 %v46_v23  ;;  %vm54_vm3 = vweird.f32 %v46_v23 }
  0xf9   :  { %v43_v24 = vpop.xlane.xlu1 %42 }
  0xfa   :  { %v45_v25 = vmul.f32 %v43_v24, %v31_v10 }
  0xfc   :  { %v92_v26 = vpop.eup %91  ;;  %v47_v27 = vadd.f32 1e-12, %v45_v25 }
  0xfd   :  { %v49_v28 = vmul.f32 %v92_v26, %v46_v23  ;;  %vm55_vm2 = vweird.f32 %v92_v26 }
  0xfe   :  { %93 = vrsqrt.f32 %v47_v27  ;;  %vm56_vm4 = vmor %vm54_vm3, %vm55_vm2  ;;  %vm64_vm6 = vweird.f32 %v47_v27 }
  0xff   :  { %v50_v29 = vmul.f32 %v92_v26, %v49_v28 }
 0x101   :  { %v51_v30 = vmul.f32 0.5, %v50_v29 }
 0x103   :  { %v52_v31 = vsub.f32 1.5, %v51_v30 }
 0x104   :  { %v94_v32 = vpop.eup %93 }
 0x105   :  { %v53_v33 = vmul.f32 %v92_v26, %v52_v31  ;;  %v59_v34 = vmul.f32 %v94_v32, %v47_v27  ;;  %vm65_vm5 = vweird.f32 %v94_v32 }
 0x106   :  { %vm66_vm7 = vmor %vm64_vm6, %vm65_vm5 }
 0x107   :  { %v57_v36 = vsel %vm56_vm4, %v92_v26, %v53_v33  ;;  %v60_v37 = vmul.f32 %v94_v32, %v59_v34 }
 0x108   :  { %v68_v39 = vmul.f32 %v57_v36, %v34_v13 }
 0x109   :  { %v61_v40 = vmul.f32 0.5, %v60_v37 }
 0x10a   :  { %v73_v41 = vmul.f32 %v87_v35, %v68_v39 }
 0x10b   :  { %v62_v42 = vsub.f32 1.5, %v61_v40 }
 0x10c   :  { %v78_v43 = vadd.f32 %v88_v38, %v73_v41 }
 0x10d   :  { %v63_v44 = vmul.f32 %v94_v32, %v62_v42 }
 0x10e   :  { %80 = vst.msk [vmem:[%s143_s3] sm:$0xff] %vm18_vm0, %v78_v43 }
 0x10f   :  { %v67_v45 = vsel %vm66_vm7, %v94_v32, %v63_v44 }
 0x110   :  { %v69_v46 = vmul.f32 %v67_v45, %v35_v18 }
 0x112   :  { %v74_v47 = vmul.f32 %v87_v35, %v69_v46 }
 0x114   :  { %v79_v48 = vadd.f32 %v88_v38, %v74_v47 }
 0x116   :  { %81 = vst.msk [vmem:[%s143_s3 + $0x8] sm:$0xff] %vm18_vm0, %v79_v48 }

// kernel: _lambda_.7
= control target key start
LH: loop header
LB: loop body
LE: loop exit
PB: predicated region body
PF: predicated region fallthrough
CT: control target
= control target key end

     0   :  { %s205_s0 = inlined_call_operand.vmem [shape: f32[2,32], index: 0, kind: input, shape index: {}]   ;;  %s206_s1 = inlined_call_operand.vmem [shape: f32[32,32], index: 1, kind: input, shape index: {}]   ;;  %s207_s2 = inlined_call_operand.vmem [shape: f32[1,32], index: 2, kind: input, shape index: {}]   ;;  %s208_s3 = inlined_call_operand.vmem [shape: f32[32,128], index: 3, kind: input, shape index: {}]   ;;  %s209_s4 = inlined_call_operand.vmem [shape: f32[1,128], index: 4, kind: input, shape index: {}]   ;;  %s210_s5 = inlined_call_operand.hbm [shape: f32[2,128], index: 5, kind: output, shape index: {}]  }
   0x1   :  { %v25_v0 = vld [vmem:[%s206_s1 + $0x18] sm:$0xff]  ;;  %v24_v1 = vld [vmem:[%s206_s1 + $0x10] sm:$0xff]  ;;  %v23_v2 = vld [vmem:[%s206_s1 + $0x8] sm:$0xff] }
   0x2   :  { %46 = vmatpush.msra.mxu0 %v25_v0 }
   0x3   :  { %10 = vsyncpa [#allocation3], 0  ;;  %v22_v3 = vld [vmem:[%s206_s1] sm:$0xff]  ;;  %vm30_vm0 = vcmask 261120   ;;  %v58_v5 = vld [vmem:[%s208_s3 + $0x18] sm:$0xff]  ;;  %s136_s13 = smov [#allocation2]  }
   0x4   :  { %47 = vmatpush.msra.mxu0 %v24_v1  ;;  %v21_v4 = vld [vmem:[%s205_s0] sm:$0x3]  ;;  %78 = vmatpush.msra.mxu1 %v58_v5  ;;  %v57_v6 = vld [vmem:[%s208_s3 + $0x10] sm:$0xff]  ;;  %v56_v7 = vld [vmem:[%s208_s3 + $0x8] sm:$0xff]  ;;  %s92_s14 = sshll.u32 %s136_s13, 4  ;;  %s94_s16 = sshll.u32 %s210_s5, 4  ;;  %s93_s14 = int_to_ptr.vmem [resolvable:$true] %s92_s14  ;;  %s95_s16 = int_to_ptr.hbm [resolvable:$true] %s94_s16 }
   0x5   :  { %v55_v8 = vld [vmem:[%s208_s3] sm:$0xff] }
   0x6   :  { %48 = vmatpush.msra.mxu0 %v23_v2  ;;  %79 = vmatpush.msra.mxu1 %v57_v6  ;;  %v106_v9 = vld [vmem:[%s207_s2] ss:$0 sm:$0xff] }
   0x7   :  { %v107_v13 = vld [vmem:[%s209_s4] ss:$0 sm:$0xff] }
   0x8   :  { %49 = vmatpush.msra.mxu0 %v22_v3  ;;  %80 = vmatpush.msra.mxu1 %v56_v7 }
   0x9   :  { %103 = vmatmul.msk.f32.vlgmr.msra.gmra.mxu0 %vm30_vm0, %v21_v4 }
   0xa   :  { %81 = vmatpush.msra.mxu1 %v55_v8 }
  0x86   :  { %v51_v10 = vpop.f32.mrf.mxu0 }
  0x87   :  { %v52_v11 = vadd.f32 %v106_v9, %v51_v10 }
  0x89   :  { %108 = vtanh.f32 %v52_v11 }
  0x8f   :  { %v109_v12 = vpop.eup %108 }
  0x90   :  { %104 = vmatmul.msk.f32.vlgmr.msra.gmra.mxu1 %vm30_vm0, %v109_v12 }
 0x10d   :  { %v83_v14 = vpop.f32.mrf.mxu1 }
 0x10e   :  { %v84_v15 = vadd.f32 %v107_v13, %v83_v14 }
 0x110   :  { %86 = vst [vmem:[#allocation2] sm:$0x3] %v84_v15 }
 0x111   :  { %97 = dma.vmem_to_hbm [thread:$0]  %s93_s14, 32, %s95_s16, [#allocation3]  }
 0x112   :  { %134 = dma.done.wait [#allocation3], 32  }
 0x113   :  { %135 = vsyncadd [#allocation3], 4294967264 }
 0x114   :  { %102 = vsyncpa [#allocation3], 1 }

// kernel: _lambda_.5
= control target key start
LH: loop header
LB: loop body
LE: loop exit
PB: predicated region body
PF: predicated region fallthrough
CT: control target
= control target key end

     0   :  { %vm58_vm0 = vcmask 261120   ;;  %s773_s25 = smov 96   ;;  %s775_s26 = smov 112   ;;  %vm91_vm1 = vcmask 130048   ;;  %vm119_vm2 = vcmask 64512   ;;  %vm229_vm3 = vcmask 261248   ;;  %s1057_s2 = inlined_call_operand.vmem [shape: f32[32,96], index: 2, kind: input, shape index: {}]   ;;  %s1058_s3 = inlined_call_operand.vmem [shape: f32[1,96], index: 3, kind: input, shape index: {}]   ;;  %s1059_s0 = inlined_call_operand.vmem [shape: f32[16,32], index: 0, kind: input, shape index: {}]   ;;  %s1060_s1 = inlined_call_operand.vmem [shape: f32[2,8], index: 1, kind: input, shape index: {}]   ;;  %s1061_s4 = inlined_call_operand.vmem [shape: f32[32,32], index: 4, kind: input, shape index: {}]   ;;  %s1062_s5 = inlined_call_operand.vmem [shape: f32[1,32], index: 5, kind: input, shape index: {}]   ;;  %s1063_s6 = inlined_call_operand.vmem [shape: f32[1,32], index: 6, kind: input, shape index: {}]   ;;  %s1064_s7 = inlined_call_operand.vmem [shape: f32[1,32], index: 7, kind: input, shape index: {}]   ;;  %s1065_s9 = inlined_call_operand.vmem [shape: f32[1,64], index: 9, kind: input, shape index: {}]   ;;  %s1066_s8 = inlined_call_operand.vmem [shape: f32[32,64], index: 8, kind: input, shape index: {}]   ;;  %s1067_s11 = inlined_call_operand.vmem [shape: f32[1,32], index: 11, kind: input, shape index: {}]   ;;  %s1068_s10 = inlined_call_operand.vmem [shape: f32[64,32], index: 10, kind: input, shape index: {}]   ;;  %s1069_s12 = inlined_call_operand.vmem [shape: f32[1,32], index: 12, kind: input, shape index: {}]   ;;  %s1070_s13 = inlined_call_operand.vmem [shape: f32[1,32], index: 13, kind: input, shape index: {}]   ;;  %s1071_s14 = inlined_call_operand.vmem [shape: f32[16,32], index: 14, kind: output, shape index: {}]  }
   0x1   :  { %v53_v0 = vld [vmem:[%s1057_s2 + $0x18] sm:$0xff]  ;;  %v52_v1 = vld [vmem:[%s1057_s2 + $0x10] sm:$0xff]  ;;  %v51_v2 = vld [vmem:[%s1057_s2 + $0x8] sm:$0xff]  ;;  %s776_s27 = smov 48   ;;  %s778_s30 = smov 16   ;;  %vm612_vm12 = vcmask 523264  }
   0x2   :  { %77 = vmatpush.msra.mxu0 %v53_v0  ;;  %v50_v3 = vld [vmem:[%s1057_s2] sm:$0xff]  ;;  %s774_s2 = smov 80   ;;  %v883_v8 = vld [vmem:[%s1059_s0 + $0x8] sm:$0xff] }
   0x3   :  { %v870_v4 = vld [vmem:[%s1059_s0] sm:$0xff] }
   0x4   :  { %78 = vmatpush.msra.mxu0 %v52_v1  ;;  %v735_v5 = vld [vmem:[%s1058_s3] ss:$0 sm:$0xff] }
   0x5   :  { %v49_v15 = vld [vmem:[%s1060_s1] sm:$0x3]  ;;  %s777_s1 = smov 64  }
   0x6   :  { %79 = vmatpush.msra.mxu0 %v51_v2  ;;  %v117_v16 = vperm.slane %v49_v15, 0  ;;  %v259_v47 = vperm.slane %v49_v15, 1  ;;  %v373_v15 = vld [vmem:[%s1061_s4] sm:$0xff] }
   0x8   :  { %80 = vmatpush.msra.mxu0 %v50_v3 }
   0x9   :  { %706 = vmatmul.msk.f32.vlgmr.msra.gmra.mxu0 %vm58_vm0, %v870_v4 }
  0x11   :  { %707 = vmatmul.msk.f32.gmra.mxu0 %vm58_vm0, %v883_v8 }
  0x86   :  { %v82_v6 = vpop.f32.mrf.mxu0 }
  0x87   :  { %v83_v7 = vadd.f32 %v735_v5, %v82_v6 }
  0x89   :  { %89 = vrot.lane.b32.xlu1 %v83_v7, %s773_s25  ;;  %160 = vrot.lane.b32.xlu0 %v83_v7, %s774_s2 }
  0x8e   :  { %v85_v13 = vpop.f32.mrf.mxu0 }
  0x8f   :  { %v891_v14 = vadd.f32 %v735_v5, %v85_v13  ;;  %v375_v13 = vld [vmem:[%s1061_s4 + $0x10] sm:$0xff] }
  0x91   :  { %158 = vrot.lane.b32.xlu0 %v83_v7, %s775_s26 }
  0x99   :  { %199 = vrot.lane.b32.xlu0 %v83_v7, %s776_s27 }
  0xa1   :  { %299 = vrot.lane.b32.xlu0 %v891_v14, %s775_s26 }
  0xfb   :  { %v90_v9 = vpop.permute.xlu1 %89  ;;  %v161_v10 = vpop.permute.xlu0 %160 }
  0xfc   :  { %708 = vmatpush.xpose.msk.msra.mxu1 %vm91_vm1, %v90_v9  ;;  %711 = vmatpush.xpose.msk.msra.mxu3 %vm91_vm1, %v161_v10  ;;  %v376_v10 = vld [vmem:[%s1061_s4 + $0x18] sm:$0xff] }
  0xff   :  { %709 = vmatmul.msk.f32.vlgmr.msra.gmra.mxu1 %vm91_vm1, %v83_v7 }
 0x103   :  { %v159_v11 = vpop.permute.xlu0 %158 }
 0x104   :  { %712 = vmatmul.msk.f32.vlgmr.msra.gmra.mxu3 %vm91_vm1, %v159_v11 }
 0x10b   :  { %v200_v12 = vpop.permute.xlu0 %199 }
 0x10c   :  { %220 = vmatpush.msra.mxu2 %v200_v12 }
 0x113   :  { %v300_v35 = vpop.permute.xlu0 %299 }
 0x17c   :  { %v113_v17 = vpop.f32.mrf.mxu1 }
 0x17d   :  { %v116_v18 = vmul.f32 0.25, %v113_v17 }
 0x17f   :  { %v118_v19 = vadd.f32 %v117_v16, %v116_v18 }
 0x181   :  { %v120_v20 = vsel %vm119_vm2, %v118_v19, -inf }
 0x182   :  { %121 = vmax.xlane.f32.xlu2 %v120_v20  ;;  %v736_v20 = vld [vmem:[%s1062_s5] ss:$0 sm:$0xff] }
 0x187   :  { %v183_v21 = vpop.f32.mrf.mxu3 }
 0x188   :  { %v186_v22 = vmul.f32 0.25, %v183_v21 }
 0x18a   :  { %v187_v23 = vadd.f32 %v186_v22, %v117_v16 }
 0x18c   :  { %v188_v24 = vsel %vm119_vm2, %v187_v23, -inf }
 0x18d   :  { %189 = vmax.xlane.f32.xlu1 %v188_v24 }
 0x1f5   :  { %v122_v25 = vpop.xlane.xlu2 %121 }
 0x1f6   :  { %v123_v26 = vsub.f32 %v118_v19, %v122_v25 }
 0x1f8   :  { %v124_v27 = vmul.f32 1.442695, %v123_v26 }
 0x1fa   :  { %743 = vpow2.f32 %v124_v27  ;;  %v779_v27 = vmov 32.0  }
 0x200   :  { %v744_v28 = vpop.eup %743  ;;  %v190_v29 = vpop.xlane.xlu1 %189 }
 0x201   :  { %v191_v30 = vsub.f32 %v187_v23, %v190_v29  ;;  %v126_v31 = vsel %vm119_vm2, %v744_v28, 0.0 }
 0x202   :  { %127 = vadd.xlane.f32.xlu0 %v126_v31 }
 0x203   :  { %v192_v32 = vmul.f32 1.442695, %v191_v30 }
 0x205   :  { %745 = vpow2.f32 %v192_v32 }
 0x20b   :  { %v746_v33 = vpop.eup %745 }
 0x20c   :  { %v194_v34 = vsel %vm119_vm2, %v746_v33, 0.0 }
 0x20d   :  { %195 = vadd.xlane.f32.xlu2 %v194_v34 }
 0x225   :  { %301 = vrot.lane.b32.xlu2 %v891_v14, %s774_s2 }
 0x22d   :  { %131 = vrot.lane.b32.xlu2 %v83_v7, %s777_s1 }
 0x235   :  { %232 = vrot.lane.b32.xlu2 %v891_v14, %s773_s25 }
 0x275   :  { %v128_v37 = vpop.xlane.xlu0 %127 }
 0x280   :  { %v196_v36 = vpop.xlane.xlu2 %195 }
 0x281   :  { %747 = vrcp.f32 %v196_v36 }
 0x282   :  { %749 = vrcp.f32 %v128_v37 }
 0x287   :  { %v748_v38 = vpop.eup %747 }
 0x288   :  { %v302_v39 = vpop.permute.xlu2 %301  ;;  %v198_v40 = vmul.f32 %v748_v38, %v746_v33  ;;  %v750_v41 = vpop.eup %749 }
 0x289   :  { %717 = vmatpush.xpose.msk.msrb.mxu2 %vm91_vm1, %v302_v39  ;;  %v130_v43 = vmul.f32 %v750_v41, %v744_v28 }
 0x28a   :  { %713 = vmatmul.msk.f32.vlgmr.msra.gmra.mxu2 %vm119_vm2, %v198_v40 }
 0x290   :  { %v132_v42 = vpop.permute.xlu2 %131 }
 0x291   :  { %152 = vmatpush.msrb.mxu1 %v132_v42  ;;  %v478_v42 = vld [vmem:[%s1066_s8 + $0x18] sm:$0xff] }
 0x292   :  { %710 = vmatmul.msk.f32.vlgmr.msrb.gmra.mxu1 %vm119_vm2, %v130_v43  ;;  %718 = vmatmul.msk.f32.vlgmr.msrb.gmra.mxu2 %vm91_vm1, %v300_v35  ;;  %v477_v43 = vld [vmem:[%s1066_s8 + $0x10] sm:$0xff] }
 0x293   :  { %501 = vmatpush.msrb.mxu0 %v478_v42 }
 0x295   :  { %502 = vmatpush.msrb.mxu0 %v477_v43 }
 0x298   :  { %v233_v44 = vpop.permute.xlu2 %232 }
 0x299   :  { %714 = vmatpush.xpose.msk.msra.mxu1 %vm91_vm1, %v233_v44  ;;  %v476_v44 = vld [vmem:[%s1066_s8 + $0x8] sm:$0xff] }
 0x29a   :  { %503 = vmatpush.msrb.mxu0 %v476_v44 }
 0x29c   :  { %715 = vmatmul.msk.f32.vlgmr.msra.gmra.mxu1 %vm91_vm1, %v891_v14 }
 0x30d   :  { %v222_v45 = vpop.f32.mrf.mxu2 }
 0x30f   :  { %v154_v46 = vpop.f32.mrf.mxu1 }
 0x310   :  { %157 = vst.msk [vmem:[#allocation2] sm:$0xff] %vm91_vm1, %v154_v46 }
 0x315   :  { %v324_v48 = vpop.f32.mrf.mxu2 }
 0x316   :  { %v327_v49 = vmul.f32 0.25, %v324_v48 }
 0x318   :  { %v328_v50 = vadd.f32 %v327_v49, %v259_v47 }
 0x319   :  { %v255_v51 = vpop.f32.mrf.mxu1 }
 0x31a   :  { %v258_v52 = vmul.f32 0.25, %v255_v51  ;;  %v329_v53 = vsel %vm119_vm2, %v328_v50, -inf }
 0x31b   :  { %330 = vmax.xlane.f32.xlu1 %v329_v53 }
 0x31c   :  { %v260_v54 = vadd.f32 %v259_v47, %v258_v52 }
 0x31e   :  { %v261_v55 = vsel %vm119_vm2, %v260_v54, -inf }
 0x31f   :  { %262 = vmax.xlane.f32.xlu2 %v261_v55 }
 0x38e   :  { %v331_v56 = vpop.xlane.xlu1 %330 }
 0x38f   :  { %v332_v57 = vsub.f32 %v328_v50, %v331_v56 }
 0x391   :  { %v333_v58 = vmul.f32 1.442695, %v332_v57  ;;  %v975_v57 = vld [vmem:[%s1064_s7] ss:$0 sm:$0xff] }
 0x392   :  { %v263_v59 = vpop.xlane.xlu2 %262 }
 0x393   :  { %751 = vpow2.f32 %v333_v58  ;;  %v264_v60 = vsub.f32 %v260_v54, %v263_v59  ;;  %v970_v54 = vld [vmem:[%s1063_s6] ss:$0 sm:$0xff] }
 0x395   :  { %v265_v61 = vmul.f32 1.442695, %v264_v60 }
 0x397   :  { %753 = vpow2.f32 %v265_v61 }
 0x399   :  { %v752_v62 = vpop.eup %751 }
 0x39a   :  { %v335_v63 = vsel %vm119_vm2, %v752_v62, 0.0 }
 0x39b   :  { %336 = vadd.xlane.f32.xlu1 %v335_v63 }
 0x39d   :  { %v754_v0 = vpop.eup %753 }
 0x39e   :  { %v267_v1 = vsel %vm119_vm2, %v754_v0, 0.0 }
 0x39f   :  { %268 = vadd.xlane.f32.xlu0 %v267_v1  ;;  %v992_v1 = vld [vmem:[%s1065_s9] ss:$0 sm:$0xff] }
 0x3b3   :  { %272 = vrot.lane.b32.xlu0 %v891_v14, %s777_s1 }
 0x3b4   :  { %340 = vrot.lane.b32.xlu1 %v891_v14, %s776_s27  ;;  %v374_v14 = vld [vmem:[%s1061_s4 + $0x8] sm:$0xff] }
 0x3bc   :  { %226 = vrot.lane.b32.xlu1 %v222_v45, %s778_s30 }
 0x40e   :  { %v337_v3 = vpop.xlane.xlu1 %336 }
 0x412   :  { %v269_v2 = vpop.xlane.xlu0 %268 }
 0x413   :  { %755 = vrcp.f32 %v269_v2 }
 0x414   :  { %757 = vrcp.f32 %v337_v3 }
 0x415   :  { %759 = vrcp.f32 %v779_v27  ;;  %v600_v27 = vld [vmem:[%s1068_s10] sm:$0xff] }
 0x419   :  { %v756_v5 = vpop.eup %755 }
 0x41a   :  { %v758_v6 = vpop.eup %757  ;;  %v271_v9 = vmul.f32 %v756_v5, %v754_v0 }
 0x41b   :  { %v339_v11 = vmul.f32 %v758_v6, %v752_v62  ;;  %v760_v28 = vpop.eup %759 }
 0x41c   :  { %v421_v29 = vmul.f32 32.0, %v760_v28  ;;  %vm425_vm4 = vweird.f32 %v760_v28 }
 0x41e   :  { %v422_v30 = vsub.f32 1.0, %v421_v29 }
 0x420   :  { %v423_v31 = vmul.f32 %v760_v28, %v422_v30 }
 0x422   :  { %v424_v32 = vadd.f32 %v760_v28, %v423_v31 }
 0x424   :  { %v948_v33 = vsel %vm425_vm4, %v760_v28, %v424_v32 }
 0x425   :  { %v273_v7 = vpop.permute.xlu0 %272 }
 0x426   :  { %v341_v12 = vpop.permute.xlu1 %340  ;;  %293 = vmatpush.msrb.mxu3 %v273_v7 }
 0x427   :  { %716 = vmatmul.msk.f32.vlgmr.msrb.gmra.mxu3 %vm119_vm2, %v271_v9  ;;  %361 = vmatpush.msrb.mxu1 %v341_v12  ;;  %v607_v9 = vld [vmem:[%s1068_s10 + $0x38] sm:$0xff]  ;;  %v606_v12 = vld [vmem:[%s1068_s10 + $0x30] sm:$0xff] }
 0x428   :  { %719 = vmatmul.msk.f32.vlgmr.msrb.gmra.mxu1 %vm119_vm2, %v339_v11  ;;  %399 = vmatpush.msra.mxu3 %v376_v10 }
 0x429   :  { %627 = vmatpush.msra.mxu2 %v607_v9 }
 0x42a   :  { %400 = vmatpush.msra.mxu3 %v375_v13 }
 0x42b   :  { %628 = vmatpush.msra.mxu2 %v606_v12 }
 0x42c   :  { %401 = vmatpush.msra.mxu3 %v374_v14 }
 0x42e   :  { %v227_v16 = vpop.permute.xlu1 %226  ;;  %402 = vmatpush.msra.mxu3 %v373_v15  ;;  %v605_v15 = vld [vmem:[%s1068_s10 + $0x28] sm:$0xff] }
 0x42f   :  { %230 = vst.msk [vmem:[#allocation2] sm:$0xff] %vm229_vm3, %v227_v16  ;;  %629 = vmatpush.msra.mxu2 %v605_v15 }
 0x436   :  { %v371_v17 = vld [vmem:[#allocation2] sm:$0xff] }
 0x437   :  { %720 = vmatmul.msk.f32.vlgmr.msra.gmra.mxu3 %vm58_vm0, %v371_v17 }
 0x4a5   :  { %v363_v18 = vpop.f32.mrf.mxu1 }
 0x4a6   :  { %367 = vrot.lane.b32.xlu2 %v363_v18, %s778_s30  ;;  %v604_v18 = vld [vmem:[%s1068_s10 + $0x20] sm:$0xff] }
 0x4a7   :  { %630 = vmatpush.msra.mxu2 %v604_v18 }
 0x4aa   :  { %v295_v19 = vpop.f32.mrf.mxu3 }
 0x4ab   :  { %298 = vst.msk [vmem:[#allocation2 + $0x8] sm:$0xff] %vm91_vm1, %v295_v19 }
 0x4ba   :  { %v404_v21 = vpop.f32.mrf.mxu3 }
 0x4bb   :  { %v405_v22 = vadd.f32 %v736_v20, %v404_v21 }
 0x4bd   :  { %v410_v23 = vadd.f32 %v405_v22, %v870_v4 }
 0x4bf   :  { %v414_v24 = vsel %vm58_vm0, %v410_v23, 0.0 }
 0x4c0   :  { %415 = vadd.xlane.f32.xlu1 %v414_v24 }
 0x500   :  { %v368_v25 = vpop.permute.xlu2 %367 }
 0x501   :  { %370 = vst.msk [vmem:[#allocation2 + $0x8] sm:$0xff] %vm229_vm3, %v368_v25  ;;  %v601_v25 = vld [vmem:[%s1068_s10 + $0x8] sm:$0xff] }
 0x508   :  { %v372_v26 = vld [vmem:[#allocation2 + $0x8] sm:$0xff] }
 0x509   :  { %721 = vmatmul.msk.f32.gmra.mxu3 %vm58_vm0, %v372_v26 }
 0x533   :  { %v416_v4 = vpop.xlane.xlu1 %415 }
 0x534   :  { %v427_v34 = vmul.f32 %v948_v33, %v416_v4 }
 0x536   :  { %v429_v35 = vsub.f32 %v410_v23, %v427_v34  ;;  %v602_v23 = vld [vmem:[%s1068_s10 + $0x10] sm:$0xff] }
 0x538   :  { %v431_v36 = vmul.f32 %v429_v35, %v429_v35 }
 0x53a   :  { %v433_v37 = vsel %vm58_vm0, %v431_v36, 0.0 }
 0x53b   :  { %434 = vadd.xlane.f32.xlu2 %v433_v37 }
 0x58c   :  { %v407_v38 = vpop.f32.mrf.mxu3 }
 0x58d   :  { %v408_v39 = vadd.f32 %v736_v20, %v407_v38  ;;  %v603_v20 = vld [vmem:[%s1068_s10 + $0x18] sm:$0xff] }
 0x58e   :  { %631 = vmatpush.msra.mxu2 %v603_v20 }
 0x58f   :  { %v411_v40 = vadd.f32 %v408_v39, %v883_v8  ;;  %v475_v8 = vld [vmem:[%s1066_s8] sm:$0xff] }
 0x590   :  { %504 = vmatpush.msrb.mxu0 %v475_v8  ;;  %632 = vmatpush.msra.mxu2 %v602_v23 }
 0x591   :  { %v417_v41 = vsel %vm58_vm0, %v411_v40, 0.0 }
 0x592   :  { %418 = vadd.xlane.f32.xlu0 %v417_v41  ;;  %633 = vmatpush.msra.mxu2 %v601_v25 }
 0x594   :  { %634 = vmatpush.msra.mxu2 %v600_v27 }
 0x5ae   :  { %v435_v45 = vpop.xlane.xlu2 %434 }
 0x5af   :  { %v439_v46 = vmul.f32 %v435_v45, %v948_v33 }
 0x5b1   :  { %v441_v47 = vadd.f32 1e-12, %v439_v46 }
 0x5b3   :  { %761 = vrsqrt.f32 %v441_v47  ;;  %vm449_vm6 = vweird.f32 %v441_v47 }
 0x5b9   :  { %v762_v48 = vpop.eup %761 }
 0x5ba   :  { %v444_v49 = vmul.f32 %v762_v48, %v441_v47  ;;  %vm450_vm5 = vweird.f32 %v762_v48 }
 0x5bb   :  { %vm451_vm7 = vmor %vm449_vm6, %vm450_vm5 }
 0x5bc   :  { %v445_v50 = vmul.f32 %v762_v48, %v444_v49 }
 0x5be   :  { %v446_v51 = vmul.f32 0.5, %v445_v50 }
 0x5c0   :  { %v447_v52 = vsub.f32 1.5, %v446_v51 }
 0x5c2   :  { %v448_v53 = vmul.f32 %v762_v48, %v447_v52 }
 0x5c4   :  { %v452_v55 = vsel %vm451_vm7, %v762_v48, %v448_v53 }
 0x5c5   :  { %v463_v56 = vmul.f32 %v452_v55, %v429_v35 }
 0x5c7   :  { %v468_v58 = vmul.f32 %v970_v54, %v463_v56 }
 0x5c9   :  { %v979_v59 = vadd.f32 %v975_v57, %v468_v58 }
 0x5cb   :  { %722 = vmatmul.msk.f32.vlgmr.msrb.gmra.mxu0 %vm58_vm0, %v979_v59 }
 0x605   :  { %v419_v60 = vpop.xlane.xlu0 %418 }
 0x606   :  { %v428_v61 = vmul.f32 %v948_v33, %v419_v60 }
 0x608   :  { %v984_v62 = vsub.f32 %v411_v40, %v428_v61 }
 0x60a   :  { %v432_v63 = vmul.f32 %v984_v62, %v984_v62 }
 0x60c   :  { %v436_v0 = vsel %vm58_vm0, %v432_v63, 0.0 }
 0x60d   :  { %437 = vadd.xlane.f32.xlu1 %v436_v0 }
 0x648   :  { %v506_v2 = vpop.f32.mrf.mxu0 }
 0x649   :  { %v507_v3 = vadd.f32 %v992_v1, %v506_v2 }
 0x64b   :  { %v514_v5 = vmul.f32 0.70710677, %v507_v3  ;;  %v512_v49 = vmul.f32 0.5, %v507_v3 }
 0x64d   :  { %v516_v6 = vmul.f32 %v514_v5, %v514_v5 }
 0x64f   :  { %v517_v7 = vmin.f32 %v516_v6, 16.0 }
 0x651   :  { %v518_v10 = vmul.f32 2.1237322e-06, %v517_v7  ;;  %v529_v11 = vmul.f32 3.8918573e-05, %v517_v7 }
 0x653   :  { %v519_v13 = vadd.f32 0.00028619796, %v518_v10  ;;  %v530_v14 = vadd.f32 0.001143296, %v529_v11 }
 0x655   :  { %v520_v16 = vmul.f32 %v519_v13, %v517_v7  ;;  %v531_v17 = vmul.f32 %v530_v14, %v517_v7 }
 0x657   :  { %v532_v19 = vadd.f32 0.014752088, %v531_v17  ;;  %v521_v21 = vadd.f32 0.0036580483, %v520_v16 }
 0x659   :  { %v533_v22 = vmul.f32 %v532_v19, %v517_v7  ;;  %v522_v26 = vmul.f32 %v521_v21, %v517_v7 }
 0x65b   :  { %v534_v24 = vadd.f32 0.112945676, %v533_v22  ;;  %v523_v30 = vadd.f32 0.05243302, %v522_v26 }
 0x65d   :  { %v535_v28 = vmul.f32 %v534_v24, %v517_v7  ;;  %v524_v4 = vmul.f32 %v523_v30, %v517_v7 }
 0x65f   :  { %v536_v29 = vadd.f32 0.4994258, %v535_v28  ;;  %v525_v34 = vadd.f32 0.18741608, %v524_v4 }
 0x661   :  { %v537_v31 = vmul.f32 %v536_v29, %v517_v7  ;;  %v526_v36 = vmul.f32 %v525_v34, %v517_v7  ;;  %v740_v7 = vld [vmem:[%s1067_s11] ss:$0 sm:$0xff] }
 0x663   :  { %v538_v32 = vadd.f32 1.0, %v537_v31  ;;  %v527_v40 = vadd.f32 1.1283791, %v526_v36 }
 0x665   :  { %763 = vrcp.f32 %v538_v32  ;;  %v550_v39 = vand.u32 2147483648, %v538_v32  ;;  %v548_v42 = vand.u32 2147483647, %v538_v32  ;;  %vm544_vm9 = vweird.f32 %v538_v32 }
 0x666   :  { %v528_v8 = vmul.f32 %v527_v40, %v514_v5 }
 0x667   :  { %v551_v44 = vor.u32 1.1754944e-38, %v550_v39  ;;  %vm549_vm11 = vcmp.eq.f32.partialorder %v548_v42, 8.507059e+37 }
 0x66b   :  { %v764_v35 = vpop.eup %763 }
 0x66c   :  { %v540_v37 = vmul.f32 %v764_v35, %v538_v32  ;;  %vm545_vm8 = vweird.f32 %v764_v35 }
 0x66d   :  { %vm546_vm10 = vmor %vm544_vm9, %vm545_vm8 }
 0x66e   :  { %v541_v38 = vsub.f32 1.0, %v540_v37 }
 0x670   :  { %v542_v41 = vmul.f32 %v764_v35, %v541_v38 }
 0x672   :  { %v543_v43 = vadd.f32 %v764_v35, %v542_v41 }
 0x674   :  { %v547_v45 = vsel %vm546_vm10, %v764_v35, %v543_v43 }
 0x675   :  { %v552_v46 = vsel %vm549_vm11, %v551_v44, %v547_v45 }
 0x676   :  { %v553_v47 = vmul.f32 %v552_v46, %v528_v8 }
 0x678   :  { %v724_v48 = vclamps-f32 %v553_v47, 1.0 }
 0x67a   :  { %v596_v50 = vadd.f32 1.0, %v724_v48 }
 0x67c   :  { %v598_v51 = vmul.f32 %v596_v50, %v512_v49 }
 0x67e   :  { %726 = vmatmul.msk.f32.vlgmr.msra.gmra.mxu2 %vm612_vm12, %v598_v51 }
 0x680   :  { %v438_v52 = vpop.xlane.xlu1 %437 }
 0x681   :  { %v440_v53 = vmul.f32 %v438_v52, %v948_v33 }
 0x683   :  { %v442_v55 = vadd.f32 1e-12, %v440_v53 }
 0x685   :  { %765 = vrsqrt.f32 %v442_v55  ;;  %vm459_vm14 = vweird.f32 %v442_v55 }
 0x68b   :  { %v766_v56 = vpop.eup %765 }
 0x68c   :  { %v454_v58 = vmul.f32 %v766_v56, %v442_v55  ;;  %vm460_vm13 = vweird.f32 %v766_v56 }
 0x68d   :  { %vm461_vm15 = vmor %vm459_vm14, %vm460_vm13 }
 0x68e   :  { %v455_v60 = vmul.f32 %v766_v56, %v454_v58 }
 0x690   :  { %v456_v61 = vmul.f32 0.5, %v455_v60 }
 0x692   :  { %v457_v63 = vsub.f32 1.5, %v456_v61 }
 0x694   :  { %v458_v0 = vmul.f32 %v766_v56, %v457_v63 }
 0x696   :  { %v462_v2 = vsel %vm461_vm15, %v766_v56, %v458_v0 }
 0x697   :  { %v464_v3 = vmul.f32 %v462_v2, %v984_v62 }
 0x699   :  { %v469_v5 = vmul.f32 %v970_v54, %v464_v3 }
 0x69b   :  { %v1024_v6 = vadd.f32 %v975_v57, %v469_v5 }
 0x69d   :  { %723 = vmatmul.msk.f32.gmra.mxu0 %vm58_vm0, %v1024_v6 }
 0x701   :  { %v636_v9 = vpop.f32.mrf.mxu2 }
 0x702   :  { %v637_v10 = vadd.f32 %v740_v7, %v636_v9 }
 0x704   :  { %v642_v11 = vadd.f32 %v637_v10, %v979_v59 }
 0x706   :  { %v646_v12 = vsel %vm58_vm0, %v642_v11, 0.0 }
 0x707   :  { %647 = vadd.xlane.f32.xlu0 %v646_v12 }
 0x71a   :  { %v509_v62 = vpop.f32.mrf.mxu0 }
 0x71b   :  { %v510_v54 = vadd.f32 %v992_v1, %v509_v62 }
 0x71d   :  { %v515_v13 = vmul.f32 0.70710677, %v510_v54  ;;  %v513_v45 = vmul.f32 0.5, %v510_v54 }
 0x71f   :  { %v556_v57 = vmul.f32 %v515_v13, %v515_v13 }
 0x721   :  { %v557_v14 = vmin.f32 %v556_v57, 16.0 }
 0x723   :  { %v558_v15 = vmul.f32 2.1237322e-06, %v557_v14  ;;  %v569_v16 = vmul.f32 3.8918573e-05, %v557_v14 }
 0x725   :  { %v559_v17 = vadd.f32 0.00028619796, %v558_v15  ;;  %v570_v18 = vadd.f32 0.001143296, %v569_v16 }
 0x727   :  { %v560_v19 = vmul.f32 %v559_v17, %v557_v14  ;;  %v571_v20 = vmul.f32 %v570_v18, %v557_v14 }
 0x729   :  { %v572_v21 = vadd.f32 0.014752088, %v571_v20  ;;  %v561_v22 = vadd.f32 0.0036580483, %v560_v19 }
 0x72b   :  { %v573_v23 = vmul.f32 %v572_v21, %v557_v14  ;;  %v562_v59 = vmul.f32 %v561_v22, %v557_v14 }
 0x72d   :  { %v574_v24 = vadd.f32 0.112945676, %v573_v23  ;;  %v563_v27 = vadd.f32 0.05243302, %v562_v59 }
 0x72f   :  { %v575_v25 = vmul.f32 %v574_v24, %v557_v14  ;;  %v564_v1 = vmul.f32 %v563_v27, %v557_v14 }
 0x731   :  { %v576_v26 = vadd.f32 0.4994258, %v575_v25  ;;  %v565_v30 = vadd.f32 0.18741608, %v564_v1 }
 0x733   :  { %v577_v28 = vmul.f32 %v576_v26, %v557_v14  ;;  %v566_v32 = vmul.f32 %v565_v30, %v557_v14 }
 0x735   :  { %v578_v29 = vadd.f32 1.0, %v577_v28  ;;  %v567_v36 = vadd.f32 1.1283791, %v566_v32 }
 0x737   :  { %767 = vrcp.f32 %v578_v29  ;;  %v590_v35 = vand.u32 2147483648, %v578_v29  ;;  %v588_v38 = vand.u32 2147483647, %v578_v29  ;;  %vm584_vm2 = vweird.f32 %v578_v29 }
 0x738   :  { %v568_v41 = vmul.f32 %v567_v36, %v515_v13 }
 0x739   :  { %v591_v40 = vor.u32 1.1754944e-38, %v590_v35  ;;  %vm589_vm4 = vcmp.eq.f32.partialorder %v588_v38, 8.507059e+37 }
 0x73d   :  { %v768_v31 = vpop.eup %767 }
 0x73e   :  { %v580_v4 = vmul.f32 %v768_v31, %v578_v29  ;;  %vm585_vm1 = vweird.f32 %v768_v31 }
 0x73f   :  { %vm586_vm3 = vmor %vm584_vm2, %vm585_vm1 }
 0x740   :  { %v581_v34 = vsub.f32 1.0, %v580_v4 }
 0x742   :  { %v582_v37 = vmul.f32 %v768_v31, %v581_v34 }
 0x744   :  { %v583_v39 = vadd.f32 %v768_v31, %v582_v37 }
 0x746   :  { %v587_v42 = vsel %vm586_vm3, %v768_v31, %v583_v39 }
 0x747   :  { %v592_v43 = vsel %vm589_vm4, %v591_v40, %v587_v42 }
 0x748   :  { %v593_v44 = vmul.f32 %v592_v43, %v568_v41 }
 0x74a   :  { %v725_v8 = vclamps-f32 %v593_v44, 1.0 }
 0x74c   :  { %v597_v46 = vadd.f32 1.0, %v725_v8 }
 0x74e   :  { %v599_v47 = vmul.f32 %v597_v46, %v513_v45 }
 0x750   :  { %727 = vmatmul.msk.f32.gmra.mxu2 %vm612_vm12, %v599_v47 }
 0x77a   :  { %v648_v48 = vpop.xlane.xlu0 %647 }
 0x77b   :  { %v652_v49 = vmul.f32 %v648_v48, %v948_v33 }
 0x77d   :  { %v654_v50 = vsub.f32 %v642_v11, %v652_v49  ;;  %v742_v11 = vld [vmem:[%s1070_s13] ss:$0 sm:$0xff] }
 0x77f   :  { %v656_v51 = vmul.f32 %v654_v50, %v654_v50 }
 0x781   :  { %v658_v52 = vsel %vm58_vm0, %v656_v51, 0.0 }
 0x782   :  { %659 = vadd.xlane.f32.xlu0 %v658_v52 }
 0x7d3   :  { %v639_v53 = vpop.f32.mrf.mxu2 }
 0x7d4   :  { %v640_v55 = vadd.f32 %v740_v7, %v639_v53 }
 0x7d6   :  { %v643_v56 = vadd.f32 %v640_v55, %v1024_v6  ;;  %v741_v6 = vld [vmem:[%s1069_s12] ss:$0 sm:$0xff] }
 0x7d8   :  { %v649_v58 = vsel %vm58_vm0, %v643_v56, 0.0 }
 0x7d9   :  { %650 = vadd.xlane.f32.xlu1 %v649_v58 }
 0x7f5   :  { %v660_v60 = vpop.xlane.xlu0 %659 }
 0x7f6   :  { %v664_v61 = vmul.f32 %v660_v60, %v948_v33 }
 0x7f8   :  { %v666_v63 = vadd.f32 1e-12, %v664_v61 }
 0x7fa   :  { %769 = vrsqrt.f32 %v666_v63  ;;  %vm674_vm6 = vweird.f32 %v666_v63 }
 0x800   :  { %v770_v0 = vpop.eup %769 }
 0x801   :  { %v669_v2 = vmul.f32 %v770_v0, %v666_v63  ;;  %vm675_vm5 = vweird.f32 %v770_v0 }
 0x802   :  { %vm676_vm7 = vmor %vm674_vm6, %vm675_vm5 }
 0x803   :  { %v670_v3 = vmul.f32 %v770_v0, %v669_v2 }
 0x805   :  { %v671_v5 = vmul.f32 0.5, %v670_v3 }
 0x807   :  { %v672_v9 = vsub.f32 1.5, %v671_v5 }
 0x809   :  { %v673_v10 = vmul.f32 %v770_v0, %v672_v9 }
 0x80b   :  { %v677_v7 = vsel %vm676_vm7, %v770_v0, %v673_v10 }
 0x80c   :  { %v688_v12 = vmul.f32 %v677_v7, %v654_v50 }
 0x80e   :  { %v693_v62 = vmul.f32 %v741_v6, %v688_v12 }
 0x810   :  { %v698_v54 = vadd.f32 %v742_v11, %v693_v62 }
 0x812   :  { %700 = vst.msk [vmem:[%s1071_s14] sm:$0xff] %vm58_vm0, %v698_v54 }
 0x84c   :  { %v651_v13 = vpop.xlane.xlu1 %650 }
 0x84d   :  { %v653_v57 = vmul.f32 %v651_v13, %v948_v33 }
 0x84f   :  { %v655_v14 = vsub.f32 %v643_v56, %v653_v57 }
 0x851   :  { %v657_v15 = vmul.f32 %v655_v14, %v655_v14 }
 0x853   :  { %v661_v16 = vsel %vm58_vm0, %v657_v15, 0.0 }
 0x854   :  { %662 = vadd.xlane.f32.xlu1 %v661_v16 }
 0x8c7   :  { %v663_v17 = vpop.xlane.xlu1 %662 }
 0x8c8   :  { %v665_v18 = vmul.f32 %v663_v17, %v948_v33 }
 0x8ca   :  { %v667_v19 = vadd.f32 1e-12, %v665_v18 }
 0x8cc   :  { %771 = vrsqrt.f32 %v667_v19  ;;  %vm684_vm9 = vweird.f32 %v667_v19 }
 0x8d2   :  { %v772_v20 = vpop.eup %771 }
 0x8d3   :  { %v679_v21 = vmul.f32 %v772_v20, %v667_v19  ;;  %vm685_vm8 = vweird.f32 %v772_v20 }
 0x8d4   :  { %vm686_vm10 = vmor %vm684_vm9, %vm685_vm8 }
 0x8d5   :  { %v680_v22 = vmul.f32 %v772_v20, %v679_v21 }
 0x8d7   :  { %v681_v23 = vmul.f32 0.5, %v680_v22 }
 0x8d9   :  { %v682_v24 = vsub.f32 1.5, %v681_v23 }
 0x8db   :  { %v683_v59 = vmul.f32 %v772_v20, %v682_v24 }
 0x8dd   :  { %v687_v25 = vsel %vm686_vm10, %v772_v20, %v683_v59 }
 0x8de   :  { %v689_v26 = vmul.f32 %v687_v25, %v655_v14 }
 0x8e0   :  { %v694_v27 = vmul.f32 %v741_v6, %v689_v26 }
 0x8e2   :  { %v699_v28 = vadd.f32 %v742_v11, %v694_v27 }
 0x8e4   :  { %701 = vst.msk [vmem:[%s1071_s14 + $0x8] sm:$0xff] %vm58_vm0, %v699_v28 }

</bundles_post_ra>
